<compile_context>
chip_gen: v7x
topology: tpu7x:2x2x1
jax: 0.10.0
libtpu: 0.0.40
codegen_flags: <defaults>
</compile_context>

<pallas_src>
import jax
import jax.numpy as jnp
from jax.experimental import pallas as pl
from jax.experimental.pallas import tpu as pltpu

EPS = 1e-5


def conv_cfgs(c_in):
    # (kernel_size, stride, padding, C_in, C_out) for the five conv stages.
    return (
        (64, 16, 1, c_in, 16),
        (3, 1, 1, 16, 32),
        (2, 1, 1, 32, 64),
        (3, 1, 1, 64, 64),
        (3, 1, 0, 64, 64),
    )


# --------------------------------------------------------------------------- #
# Pallas kernels
# --------------------------------------------------------------------------- #
def conv_bn_relu_pool_kernel(p_ref, w_ref, b_ref, g_ref, beta_ref, s_ref, o_ref):
    """One WDCNN stage: conv (as im2col matmul) + bias, train-mode BatchNorm
    (fused single-pass stats, folded scale/offset), ReLU, MaxPool1d(2,2).

    p_ref    : (M, K*Cin)   im2col patches, M = N * L_out rows
    w_ref    : (K*Cin, Cout) conv weight as a matmul operand
    b_ref    : (1, Cout)    conv bias
    g_ref    : (1, Cout)    BN gamma
    beta_ref : (1, Cout)    BN beta
    s_ref    : (Mp, M-1)    0/1 selection matrix implementing the stride-2 pick
                            of MaxPool (adjacent max is computed in-register)
    o_ref    : (Mp, Cout)   pooled output
    """
    y = jnp.dot(p_ref[...], w_ref[...], preferred_element_type=jnp.float32)
    y = y + b_ref[...]

    # Fused train-mode BatchNorm: one pass for sum / sum-of-squares, then a
    # single folded scale/offset apply (biased variance, eps=1e-5).
    m_rows = y.shape[0]
    inv_m = 1.0 / m_rows
    mean = jnp.sum(y, axis=0, keepdims=True) * inv_m
    mean_sq = jnp.sum(y * y, axis=0, keepdims=True) * inv_m
    var = mean_sq - mean * mean
    scale = g_ref[...] * jax.lax.rsqrt(var + EPS)
    shift = beta_ref[...] - mean * scale
    y = jnp.maximum(y * scale + shift, 0.0)          # BN + ReLU

    # MaxPool1d(kernel=2, stride=2): max of adjacent rows, then select every
    # second row per batch element with a tiny 0/1 matmul.  Rows that straddle
    # a batch boundary are never selected, so the flat (N*L) layout is safe.
    adj = jnp.maximum(y[:-1, :], y[1:, :])
    o_ref[...] = jnp.dot(s_ref[...], adj,
                         preferred_element_type=jnp.float32).astype(o_ref.dtype)


def head_kernel(f_ref, w1_ref, b1_ref, w2_ref, b2_ref, w3_ref, b3_ref, o_ref):
    """fc: Linear(64,100)+ReLU, Linear(100,100)+ReLU;
    classifier: Linear(100,C) + LogSoftmax(dim=1)."""
    h = jnp.dot(f_ref[...], w1_ref[...], preferred_element_type=jnp.float32)
    h = jnp.maximum(h + b1_ref[...], 0.0)
    h = jnp.dot(h, w2_ref[...], preferred_element_type=jnp.float32)
    h = jnp.maximum(h + b2_ref[...], 0.0)
    logits = jnp.dot(h, w3_ref[...], preferred_element_type=jnp.float32) + b3_ref[...]
    z = logits - jnp.max(logits, axis=1, keepdims=True)
    lse = jnp.log(jnp.sum(jnp.exp(z), axis=1, keepdims=True))
    o_ref[...] = (z - lse).astype(o_ref.dtype)


# --------------------------------------------------------------------------- #
# Wrapper: layout plumbing (im2col / padding / pool-selection matrices)
# --------------------------------------------------------------------------- #
_VMEM = pl.BlockSpec(memory_space=pltpu.MemorySpace.VMEM)


def _im2col_1d(x_nlc, k, stride, pad):
    """(N, L, C) -> (N*Lout, K*C) patches; feature index = kk*C + c.  Layout only."""
    n, l, c = x_nlc.shape
    xp = jnp.pad(x_nlc, ((0, 0), (pad, pad), (0, 0)))
    lout = (l + 2 * pad - k) // stride + 1
    cols = [xp[:, kk: kk + stride * (lout - 1) + 1: stride, :] for kk in range(k)]
    patches = jnp.concatenate(cols, axis=-1)          # (N, Lout, K*C)
    return patches.reshape(n * lout, k * c), lout


def _pool_select(n, l):
    """0/1 matrix (N*(L//2), N*L-1) that picks row n*L + 2*j of the adjacent-max."""
    lo = l // 2
    r = jnp.arange(n * lo)
    src = (r // lo) * l + 2 * (r % lo)
    return (src[:, None] == jnp.arange(n * l - 1)[None, :]).astype(jnp.float32)


def _conv_stage(patches, w, b, g, beta, sel):
    mp = sel.shape[0]
    cout = w.shape[1]
    return pl.pallas_call(
        conv_bn_relu_pool_kernel,
        out_shape=jax.ShapeDtypeStruct((mp, cout), jnp.float32),
        in_specs=[_VMEM] * 6,
        out_specs=_VMEM,
    )(patches, w, b, g, beta, sel)


def _head(feat, p):
    n = feat.shape[0]
    ncls = p["wcls"].shape[1]
    return pl.pallas_call(
        head_kernel,
        out_shape=jax.ShapeDtypeStruct((n, ncls), jnp.float32),
        in_specs=[_VMEM] * 7,
        out_specs=_VMEM,
    )(feat, p["wfc1"], p["bfc1"], p["wfc2"], p["bfc2"], p["wcls"], p["bcls"])


@jax.jit
def wdcnn_forward(x_ncl, params):
    """x_ncl: (N, C_in, L) float32 (PyTorch layout)."""
    n, c_in, _ = x_ncl.shape
    a = jnp.transpose(x_ncl, (0, 2, 1)).astype(jnp.float32)   # channels-last (N, L, C)
    for i, (k, s, p, _, cout) in enumerate(conv_cfgs(c_in)):
        patches, lout = _im2col_1d(a, k, s, p)                # layout only
        sel = _pool_select(n, lout)                           # layout only (constant)
        pooled = _conv_stage(patches, params[f"w{i}"], params[f"b{i}"],
                             params[f"g{i}"], params[f"beta{i}"], sel)
        a = pooled.reshape(n, lout // 2, cout)
    # Linear(in_features=64) requires the conv tower to reduce L to 1.
    assert a.shape[1] == 1, a.shape
    feat = a.reshape(n, -1)                                   # (N, 64) == torch .view()
    return _head(feat, params)


# --------------------------------------------------------------------------- #
# Pure-JAX reference (PyTorch semantics) and parameter construction
# --------------------------------------------------------------------------- #
def wdcnn_reference(x_ncl, params):
    n, c_in, _ = x_ncl.shape
    with jax.default_matmul_precision("float32"):
        a = x_ncl.astype(jnp.float32)
        for i, (k, s, pad, cin, cout) in enumerate(conv_cfgs(c_in)):
            w_mat = params[f"w{i}"]                                     # (K*Cin, Cout)
            w_oik = jnp.transpose(w_mat.reshape(k, cin, cout), (2, 1, 0))  # (Cout,Cin,K)
            y = jax.lax.conv_general_dilated(
                a, w_oik, window_strides=(s,), padding=[(pad, pad)],
                dimension_numbers=("NCH", "OIH", "NCH"))
            y = y + params[f"b{i}"].reshape(1, cout, 1)
            mean = jnp.mean(y, axis=(0, 2), keepdims=True)
            var = jnp.mean((y - mean) ** 2, axis=(0, 2), keepdims=True)
            y = (y - mean) * jax.lax.rsqrt(var + EPS)
            y = y * params[f"g{i}"].reshape(1, cout, 1) + params[f"beta{i}"].reshape(1, cout, 1)
            y = jnp.maximum(y, 0.0)
            lo = y.shape[2] // 2
            y = jnp.max(y[:, :, : 2 * lo].reshape(n, cout, lo, 2), axis=3)
            a = y
        feat = a.reshape(n, -1)
        h = jnp.maximum(feat @ params["wfc1"] + params["bfc1"], 0.0)
        h = jnp.maximum(h @ params["wfc2"] + params["bfc2"], 0.0)
        logits = h @ params["wcls"] + params["bcls"]
        return jax.nn.log_softmax(logits, axis=1)


def make_params(key, c_in, class_num):
    """Conv weights are stored as matmul operands (K*Cin, Cout) so that
    W_mat[k*Cin + c, co] == torch_conv_weight[co, c, k]."""
    cfgs = conv_cfgs(c_in)
    keys = jax.random.split(key, 4 * len(cfgs) + 6)
    p = {}
    idx = 0
    for i, (k, s, pad, cin, cout) in enumerate(cfgs):
        p[f"w{i}"] = 0.1 * jax.random.normal(keys[idx], (k * cin, cout), jnp.float32); idx += 1
        p[f"b{i}"] = 0.1 * jax.random.normal(keys[idx], (1, cout), jnp.float32); idx += 1
        p[f"g{i}"] = 1.0 + 0.1 * jax.random.normal(keys[idx], (1, cout), jnp.float32); idx += 1
        p[f"beta{i}"] = 0.1 * jax.random.normal(keys[idx], (1, cout), jnp.float32); idx += 1
    p["wfc1"] = 0.1 * jax.random.normal(keys[idx], (64, 100), jnp.float32); idx += 1
    p["bfc1"] = 0.1 * jax.random.normal(keys[idx], (1, 100), jnp.float32); idx += 1
    p["wfc2"] = 0.1 * jax.random.normal(keys[idx], (100, 100), jnp.float32); idx += 1
    p["bfc2"] = 0.1 * jax.random.normal(keys[idx], (1, 100), jnp.float32); idx += 1
    p["wcls"] = 0.1 * jax.random.normal(keys[idx], (100, class_num), jnp.float32); idx += 1
    p["bcls"] = 0.1 * jax.random.normal(keys[idx], (1, class_num), jnp.float32); idx += 1
    return p


if __name__ == "__main__":
    key = jax.random.PRNGKey(0)
    kx, kp = jax.random.split(key)

    # L=1024 is what forward() implies: the conv tower reduces it to length 1,
    # giving exactly 64 flat features for Linear(in_features=64).
    N, C_IN, L = 2, 2, 1024
    CLASS_NUM = 10

    x = jax.random.normal(kx, (N, C_IN, L), jnp.float32)
    params = make_params(kp, C_IN, CLASS_NUM)

    out = wdcnn_forward(x, params)
    out = jax.block_until_ready(out)
    assert out.shape == (N, CLASS_NUM), out.shape

    ref = wdcnn_reference(x, params)
    assert jnp.allclose(out, ref, rtol=5e-3, atol=5e-3), float(
        jnp.max(jnp.abs(out - ref)))
    # log-softmax rows must exponentiate-sum to ~1
    assert jnp.allclose(jnp.sum(jnp.exp(out), axis=1), 1.0, atol=1e-4)

    print("KERNEL_OK")
</pallas_src>

<mosaic_0001>
module attributes {stable_mosaic.version = 11 : i64} {
  func.func @conv_bn_relu_pool_kernel(%arg0: memref<122x128xf32, #tpu.memory_space<vmem>>, %arg1: memref<128x16xf32, #tpu.memory_space<vmem>>, %arg2: memref<1x16xf32, #tpu.memory_space<vmem>>, %arg3: memref<1x16xf32, #tpu.memory_space<vmem>>, %arg4: memref<1x16xf32, #tpu.memory_space<vmem>>, %arg5: memref<60x121xf32, #tpu.memory_space<vmem>>, %arg6: memref<60x16xf32, #tpu.memory_space<vmem>>) attributes {dimension_semantics = [], scalar_prefetch = 0 : i64, scratch_operands = 0 : i64, tpu.core_type = #tpu.core_type<tc>} {
    %c0 = arith.constant 0 : index
    %c0_0 = arith.constant 0 : index
    %0 = vector.load %arg0[%c0, %c0_0] : memref<122x128xf32, #tpu.memory_space<vmem>>, vector<122x128xf32>
    %c0_1 = arith.constant 0 : index
    %c0_2 = arith.constant 0 : index
    %1 = vector.load %arg1[%c0_1, %c0_2] : memref<128x16xf32, #tpu.memory_space<vmem>>, vector<128x16xf32>
    %cst = arith.constant dense<0.000000e+00> : vector<122x16xf32>
    %2 = tpu.matmul %0, %1, %cst {dimension_numbers = #tpu.dot_dimension_numbers<[1], [0], [0], [1], [0, 0, 1, 1], [], []>} : vector<122x128xf32>, vector<128x16xf32>, vector<122x16xf32> -> vector<122x16xf32>
    %c0_3 = arith.constant 0 : index
    %c0_4 = arith.constant 0 : index
    %3 = vector.load %arg2[%c0_3, %c0_4] : memref<1x16xf32, #tpu.memory_space<vmem>>, vector<1x16xf32>
    %4 = vector.broadcast %3 : vector<1x16xf32> to vector<122x16xf32>
    %5 = arith.addf %2, %4 : vector<122x16xf32>
    %cst_5 = arith.constant dense<0.000000e+00> : vector<16xf32>
    %6 = vector.multi_reduction <add>, %5, %cst_5 [0] : vector<122x16xf32> to vector<16xf32>
    %7 = vector.shape_cast %6 : vector<16xf32> to vector<1x16xf32>
    %cst_6 = arith.constant 0.00819672085 : f32
    %8 = vector.broadcast %cst_6 : f32 to vector<1x16xf32>
    %9 = arith.mulf %7, %8 : vector<1x16xf32>
    %10 = arith.mulf %5, %5 : vector<122x16xf32>
    %cst_7 = arith.constant dense<0.000000e+00> : vector<16xf32>
    %11 = vector.multi_reduction <add>, %10, %cst_7 [0] : vector<122x16xf32> to vector<16xf32>
    %12 = vector.shape_cast %11 : vector<16xf32> to vector<1x16xf32>
    %cst_8 = arith.constant 0.00819672085 : f32
    %13 = vector.broadcast %cst_8 : f32 to vector<1x16xf32>
    %14 = arith.mulf %12, %13 : vector<1x16xf32>
    %15 = arith.mulf %9, %9 : vector<1x16xf32>
    %16 = arith.subf %14, %15 : vector<1x16xf32>
    %c0_9 = arith.constant 0 : index
    %c0_10 = arith.constant 0 : index
    %17 = vector.load %arg3[%c0_9, %c0_10] : memref<1x16xf32, #tpu.memory_space<vmem>>, vector<1x16xf32>
    %cst_11 = arith.constant 9.99999974E-6 : f32
    %18 = vector.broadcast %cst_11 : f32 to vector<1x16xf32>
    %19 = arith.addf %16, %18 : vector<1x16xf32>
    %20 = math.rsqrt %19 : vector<1x16xf32>
    %21 = arith.mulf %17, %20 : vector<1x16xf32>
    %c0_12 = arith.constant 0 : index
    %c0_13 = arith.constant 0 : index
    %22 = vector.load %arg4[%c0_12, %c0_13] : memref<1x16xf32, #tpu.memory_space<vmem>>, vector<1x16xf32>
    %23 = arith.mulf %9, %21 : vector<1x16xf32>
    %24 = arith.subf %22, %23 : vector<1x16xf32>
    %25 = vector.broadcast %21 : vector<1x16xf32> to vector<122x16xf32>
    %26 = arith.mulf %5, %25 : vector<122x16xf32>
    %27 = vector.broadcast %24 : vector<1x16xf32> to vector<122x16xf32>
    %28 = arith.addf %26, %27 : vector<122x16xf32>
    %cst_14 = arith.constant 0.000000e+00 : f32
    %29 = vector.broadcast %cst_14 : f32 to vector<122x16xf32>
    %30 = arith.maximumf %28, %29 : vector<122x16xf32>
    %31 = vector.extract_strided_slice %30 {offsets = [0, 0], sizes = [121, 16], strides = [1, 1]} : vector<122x16xf32> to vector<121x16xf32>
    %32 = vector.extract_strided_slice %30 {offsets = [1, 0], sizes = [121, 16], strides = [1, 1]} : vector<122x16xf32> to vector<121x16xf32>
    %33 = arith.maximumf %31, %32 : vector<121x16xf32>
    %c0_15 = arith.constant 0 : index
    %c0_16 = arith.constant 0 : index
    %34 = vector.load %arg5[%c0_15, %c0_16] : memref<60x121xf32, #tpu.memory_space<vmem>>, vector<60x121xf32>
    %cst_17 = arith.constant dense<0.000000e+00> : vector<60x16xf32>
    %35 = tpu.matmul %34, %33, %cst_17 {dimension_numbers = #tpu.dot_dimension_numbers<[1], [0], [0], [1], [0, 0, 1, 1], [], []>} : vector<60x121xf32>, vector<121x16xf32>, vector<60x16xf32> -> vector<60x16xf32>
    %c0_18 = arith.constant 0 : index
    %c0_19 = arith.constant 0 : index
    %36 = vector.load %arg6[%c0_18, %c0_19] : memref<60x16xf32, #tpu.memory_space<vmem>>, vector<60x16xf32>
    tpu.vector_store %arg6[%c0_18, %c0_19], %35 {strides = array<i32>} : memref<60x16xf32, #tpu.memory_space<vmem>>, vector<60x16xf32>,
    return
  }
}

module attributes {stable_mosaic.version = 11 : i64} {
  func.func @conv_bn_relu_pool_kernel(%arg0: memref<60x48xf32, #tpu.memory_space<vmem>>, %arg1: memref<48x32xf32, #tpu.memory_space<vmem>>, %arg2: memref<1x32xf32, #tpu.memory_space<vmem>>, %arg3: memref<1x32xf32, #tpu.memory_space<vmem>>, %arg4: memref<1x32xf32, #tpu.memory_space<vmem>>, %arg5: memref<30x59xf32, #tpu.memory_space<vmem>>, %arg6: memref<30x32xf32, #tpu.memory_space<vmem>>) attributes {dimension_semantics = [], scalar_prefetch = 0 : i64, scratch_operands = 0 : i64, tpu.core_type = #tpu.core_type<tc>} {
    %c0 = arith.constant 0 : index
    %c0_0 = arith.constant 0 : index
    %0 = vector.load %arg0[%c0, %c0_0] : memref<60x48xf32, #tpu.memory_space<vmem>>, vector<60x48xf32>
    %c0_1 = arith.constant 0 : index
    %c0_2 = arith.constant 0 : index
    %1 = vector.load %arg1[%c0_1, %c0_2] : memref<48x32xf32, #tpu.memory_space<vmem>>, vector<48x32xf32>
    %cst = arith.constant dense<0.000000e+00> : vector<60x32xf32>
    %2 = tpu.matmul %0, %1, %cst {dimension_numbers = #tpu.dot_dimension_numbers<[1], [0], [0], [1], [0, 0, 1, 1], [], []>} : vector<60x48xf32>, vector<48x32xf32>, vector<60x32xf32> -> vector<60x32xf32>
    %c0_3 = arith.constant 0 : index
    %c0_4 = arith.constant 0 : index
    %3 = vector.load %arg2[%c0_3, %c0_4] : memref<1x32xf32, #tpu.memory_space<vmem>>, vector<1x32xf32>
    %4 = vector.broadcast %3 : vector<1x32xf32> to vector<60x32xf32>
    %5 = arith.addf %2, %4 : vector<60x32xf32>
    %cst_5 = arith.constant dense<0.000000e+00> : vector<32xf32>
    %6 = vector.multi_reduction <add>, %5, %cst_5 [0] : vector<60x32xf32> to vector<32xf32>
    %7 = vector.shape_cast %6 : vector<32xf32> to vector<1x32xf32>
    %cst_6 = arith.constant 0.0166666675 : f32
    %8 = vector.broadcast %cst_6 : f32 to vector<1x32xf32>
    %9 = arith.mulf %7, %8 : vector<1x32xf32>
    %10 = arith.mulf %5, %5 : vector<60x32xf32>
    %cst_7 = arith.constant dense<0.000000e+00> : vector<32xf32>
    %11 = vector.multi_reduction <add>, %10, %cst_7 [0] : vector<60x32xf32> to vector<32xf32>
    %12 = vector.shape_cast %11 : vector<32xf32> to vector<1x32xf32>
    %cst_8 = arith.constant 0.0166666675 : f32
    %13 = vector.broadcast %cst_8 : f32 to vector<1x32xf32>
    %14 = arith.mulf %12, %13 : vector<1x32xf32>
    %15 = arith.mulf %9, %9 : vector<1x32xf32>
    %16 = arith.subf %14, %15 : vector<1x32xf32>
    %c0_9 = arith.constant 0 : index
    %c0_10 = arith.constant 0 : index
    %17 = vector.load %arg3[%c0_9, %c0_10] : memref<1x32xf32, #tpu.memory_space<vmem>>, vector<1x32xf32>
    %cst_11 = arith.constant 9.99999974E-6 : f32
    %18 = vector.broadcast %cst_11 : f32 to vector<1x32xf32>
    %19 = arith.addf %16, %18 : vector<1x32xf32>
    %20 = math.rsqrt %19 : vector<1x32xf32>
    %21 = arith.mulf %17, %20 : vector<1x32xf32>
    %c0_12 = arith.constant 0 : index
    %c0_13 = arith.constant 0 : index
    %22 = vector.load %arg4[%c0_12, %c0_13] : memref<1x32xf32, #tpu.memory_space<vmem>>, vector<1x32xf32>
    %23 = arith.mulf %9, %21 : vector<1x32xf32>
    %24 = arith.subf %22, %23 : vector<1x32xf32>
    %25 = vector.broadcast %21 : vector<1x32xf32> to vector<60x32xf32>
    %26 = arith.mulf %5, %25 : vector<60x32xf32>
    %27 = vector.broadcast %24 : vector<1x32xf32> to vector<60x32xf32>
    %28 = arith.addf %26, %27 : vector<60x32xf32>
    %cst_14 = arith.constant 0.000000e+00 : f32
    %29 = vector.broadcast %cst_14 : f32 to vector<60x32xf32>
    %30 = arith.maximumf %28, %29 : vector<60x32xf32>
    %31 = vector.extract_strided_slice %30 {offsets = [0, 0], sizes = [59, 32], strides = [1, 1]} : vector<60x32xf32> to vector<59x32xf32>
    %32 = vector.extract_strided_slice %30 {offsets = [1, 0], sizes = [59, 32], strides = [1, 1]} : vector<60x32xf32> to vector<59x32xf32>
    %33 = arith.maximumf %31, %32 : vector<59x32xf32>
    %c0_15 = arith.constant 0 : index
    %c0_16 = arith.constant 0 : index
    %34 = vector.load %arg5[%c0_15, %c0_16] : memref<30x59xf32, #tpu.memory_space<vmem>>, vector<30x59xf32>
    %cst_17 = arith.constant dense<0.000000e+00> : vector<30x32xf32>
    %35 = tpu.matmul %34, %33, %cst_17 {dimension_numbers = #tpu.dot_dimension_numbers<[1], [0], [0], [1], [0, 0, 1, 1], [], []>} : vector<30x59xf32>, vector<59x32xf32>, vector<30x32xf32> -> vector<30x32xf32>
    %c0_18 = arith.constant 0 : index
    %c0_19 = arith.constant 0 : index
    %36 = vector.load %arg6[%c0_18, %c0_19] : memref<30x32xf32, #tpu.memory_space<vmem>>, vector<30x32xf32>
    tpu.vector_store %arg6[%c0_18, %c0_19], %35 {strides = array<i32>} : memref<30x32xf32, #tpu.memory_space<vmem>>, vector<30x32xf32>,
    return
  }
}

module attributes {stable_mosaic.version = 11 : i64} {
  func.func @conv_bn_relu_pool_kernel(%arg0: memref<32x64xf32, #tpu.memory_space<vmem>>, %arg1: memref<64x64xf32, #tpu.memory_space<vmem>>, %arg2: memref<1x64xf32, #tpu.memory_space<vmem>>, %arg3: memref<1x64xf32, #tpu.memory_space<vmem>>, %arg4: memref<1x64xf32, #tpu.memory_space<vmem>>, %arg5: memref<16x31xf32, #tpu.memory_space<vmem>>, %arg6: memref<16x64xf32, #tpu.memory_space<vmem>>) attributes {dimension_semantics = [], scalar_prefetch = 0 : i64, scratch_operands = 0 : i64, tpu.core_type = #tpu.core_type<tc>} {
    %c0 = arith.constant 0 : index
    %c0_0 = arith.constant 0 : index
    %0 = vector.load %arg0[%c0, %c0_0] : memref<32x64xf32, #tpu.memory_space<vmem>>, vector<32x64xf32>
    %c0_1 = arith.constant 0 : index
    %c0_2 = arith.constant 0 : index
    %1 = vector.load %arg1[%c0_1, %c0_2] : memref<64x64xf32, #tpu.memory_space<vmem>>, vector<64x64xf32>
    %cst = arith.constant dense<0.000000e+00> : vector<32x64xf32>
    %2 = tpu.matmul %0, %1, %cst {dimension_numbers = #tpu.dot_dimension_numbers<[1], [0], [0], [1], [0, 0, 1, 1], [], []>} : vector<32x64xf32>, vector<64x64xf32>, vector<32x64xf32> -> vector<32x64xf32>
    %c0_3 = arith.constant 0 : index
    %c0_4 = arith.constant 0 : index
    %3 = vector.load %arg2[%c0_3, %c0_4] : memref<1x64xf32, #tpu.memory_space<vmem>>, vector<1x64xf32>
    %4 = vector.broadcast %3 : vector<1x64xf32> to vector<32x64xf32>
    %5 = arith.addf %2, %4 : vector<32x64xf32>
    %cst_5 = arith.constant dense<0.000000e+00> : vector<64xf32>
    %6 = vector.multi_reduction <add>, %5, %cst_5 [0] : vector<32x64xf32> to vector<64xf32>
    %7 = vector.shape_cast %6 : vector<64xf32> to vector<1x64xf32>
    %cst_6 = arith.constant 3.125000e-02 : f32
    %8 = vector.broadcast %cst_6 : f32 to vector<1x64xf32>
    %9 = arith.mulf %7, %8 : vector<1x64xf32>
    %10 = arith.mulf %5, %5 : vector<32x64xf32>
    %cst_7 = arith.constant dense<0.000000e+00> : vector<64xf32>
    %11 = vector.multi_reduction <add>, %10, %cst_7 [0] : vector<32x64xf32> to vector<64xf32>
    %12 = vector.shape_cast %11 : vector<64xf32> to vector<1x64xf32>
    %cst_8 = arith.constant 3.125000e-02 : f32
    %13 = vector.broadcast %cst_8 : f32 to vector<1x64xf32>
    %14 = arith.mulf %12, %13 : vector<1x64xf32>
    %15 = arith.mulf %9, %9 : vector<1x64xf32>
    %16 = arith.subf %14, %15 : vector<1x64xf32>
    %c0_9 = arith.constant 0 : index
    %c0_10 = arith.constant 0 : index
    %17 = vector.load %arg3[%c0_9, %c0_10] : memref<1x64xf32, #tpu.memory_space<vmem>>, vector<1x64xf32>
    %cst_11 = arith.constant 9.99999974E-6 : f32
    %18 = vector.broadcast %cst_11 : f32 to vector<1x64xf32>
    %19 = arith.addf %16, %18 : vector<1x64xf32>
    %20 = math.rsqrt %19 : vector<1x64xf32>
    %21 = arith.mulf %17, %20 : vector<1x64xf32>
    %c0_12 = arith.constant 0 : index
    %c0_13 = arith.constant 0 : index
    %22 = vector.load %arg4[%c0_12, %c0_13] : memref<1x64xf32, #tpu.memory_space<vmem>>, vector<1x64xf32>
    %23 = arith.mulf %9, %21 : vector<1x64xf32>
    %24 = arith.subf %22, %23 : vector<1x64xf32>
    %25 = vector.broadcast %21 : vector<1x64xf32> to vector<32x64xf32>
    %26 = arith.mulf %5, %25 : vector<32x64xf32>
    %27 = vector.broadcast %24 : vector<1x64xf32> to vector<32x64xf32>
    %28 = arith.addf %26, %27 : vector<32x64xf32>
    %cst_14 = arith.constant 0.000000e+00 : f32
    %29 = vector.broadcast %cst_14 : f32 to vector<32x64xf32>
    %30 = arith.maximumf %28, %29 : vector<32x64xf32>
    %31 = vector.extract_strided_slice %30 {offsets = [0, 0], sizes = [31, 64], strides = [1, 1]} : vector<32x64xf32> to vector<31x64xf32>
    %32 = vector.extract_strided_slice %30 {offsets = [1, 0], sizes = [31, 64], strides = [1, 1]} : vector<32x64xf32> to vector<31x64xf32>
    %33 = arith.maximumf %31, %32 : vector<31x64xf32>
    %c0_15 = arith.constant 0 : index
    %c0_16 = arith.constant 0 : index
    %34 = vector.load %arg5[%c0_15, %c0_16] : memref<16x31xf32, #tpu.memory_space<vmem>>, vector<16x31xf32>
    %cst_17 = arith.constant dense<0.000000e+00> : vector<16x64xf32>
    %35 = tpu.matmul %34, %33, %cst_17 {dimension_numbers = #tpu.dot_dimension_numbers<[1], [0], [0], [1], [0, 0, 1, 1], [], []>} : vector<16x31xf32>, vector<31x64xf32>, vector<16x64xf32> -> vector<16x64xf32>
    %c0_18 = arith.constant 0 : index
    %c0_19 = arith.constant 0 : index
    %36 = vector.load %arg6[%c0_18, %c0_19] : memref<16x64xf32, #tpu.memory_space<vmem>>, vector<16x64xf32>
    tpu.vector_store %arg6[%c0_18, %c0_19], %35 {strides = array<i32>} : memref<16x64xf32, #tpu.memory_space<vmem>>, vector<16x64xf32>,
    return
  }
}

module attributes {stable_mosaic.version = 11 : i64} {
  func.func @conv_bn_relu_pool_kernel(%arg0: memref<16x192xf32, #tpu.memory_space<vmem>>, %arg1: memref<192x64xf32, #tpu.memory_space<vmem>>, %arg2: memref<1x64xf32, #tpu.memory_space<vmem>>, %arg3: memref<1x64xf32, #tpu.memory_space<vmem>>, %arg4: memref<1x64xf32, #tpu.memory_space<vmem>>, %arg5: memref<8x15xf32, #tpu.memory_space<vmem>>, %arg6: memref<8x64xf32, #tpu.memory_space<vmem>>) attributes {dimension_semantics = [], scalar_prefetch = 0 : i64, scratch_operands = 0 : i64, tpu.core_type = #tpu.core_type<tc>} {
    %c0 = arith.constant 0 : index
    %c0_0 = arith.constant 0 : index
    %0 = vector.load %arg0[%c0, %c0_0] : memref<16x192xf32, #tpu.memory_space<vmem>>, vector<16x192xf32>
    %c0_1 = arith.constant 0 : index
    %c0_2 = arith.constant 0 : index
    %1 = vector.load %arg1[%c0_1, %c0_2] : memref<192x64xf32, #tpu.memory_space<vmem>>, vector<192x64xf32>
    %cst = arith.constant dense<0.000000e+00> : vector<16x64xf32>
    %2 = tpu.matmul %0, %1, %cst {dimension_numbers = #tpu.dot_dimension_numbers<[1], [0], [0], [1], [0, 0, 1, 1], [], []>} : vector<16x192xf32>, vector<192x64xf32>, vector<16x64xf32> -> vector<16x64xf32>
    %c0_3 = arith.constant 0 : index
    %c0_4 = arith.constant 0 : index
    %3 = vector.load %arg2[%c0_3, %c0_4] : memref<1x64xf32, #tpu.memory_space<vmem>>, vector<1x64xf32>
    %4 = vector.broadcast %3 : vector<1x64xf32> to vector<16x64xf32>
    %5 = arith.addf %2, %4 : vector<16x64xf32>
    %cst_5 = arith.constant dense<0.000000e+00> : vector<64xf32>
    %6 = vector.multi_reduction <add>, %5, %cst_5 [0] : vector<16x64xf32> to vector<64xf32>
    %7 = vector.shape_cast %6 : vector<64xf32> to vector<1x64xf32>
    %cst_6 = arith.constant 6.250000e-02 : f32
    %8 = vector.broadcast %cst_6 : f32 to vector<1x64xf32>
    %9 = arith.mulf %7, %8 : vector<1x64xf32>
    %10 = arith.mulf %5, %5 : vector<16x64xf32>
    %cst_7 = arith.constant dense<0.000000e+00> : vector<64xf32>
    %11 = vector.multi_reduction <add>, %10, %cst_7 [0] : vector<16x64xf32> to vector<64xf32>
    %12 = vector.shape_cast %11 : vector<64xf32> to vector<1x64xf32>
    %cst_8 = arith.constant 6.250000e-02 : f32
    %13 = vector.broadcast %cst_8 : f32 to vector<1x64xf32>
    %14 = arith.mulf %12, %13 : vector<1x64xf32>
    %15 = arith.mulf %9, %9 : vector<1x64xf32>
    %16 = arith.subf %14, %15 : vector<1x64xf32>
    %c0_9 = arith.constant 0 : index
    %c0_10 = arith.constant 0 : index
    %17 = vector.load %arg3[%c0_9, %c0_10] : memref<1x64xf32, #tpu.memory_space<vmem>>, vector<1x64xf32>
    %cst_11 = arith.constant 9.99999974E-6 : f32
    %18 = vector.broadcast %cst_11 : f32 to vector<1x64xf32>
    %19 = arith.addf %16, %18 : vector<1x64xf32>
    %20 = math.rsqrt %19 : vector<1x64xf32>
    %21 = arith.mulf %17, %20 : vector<1x64xf32>
    %c0_12 = arith.constant 0 : index
    %c0_13 = arith.constant 0 : index
    %22 = vector.load %arg4[%c0_12, %c0_13] : memref<1x64xf32, #tpu.memory_space<vmem>>, vector<1x64xf32>
    %23 = arith.mulf %9, %21 : vector<1x64xf32>
    %24 = arith.subf %22, %23 : vector<1x64xf32>
    %25 = vector.broadcast %21 : vector<1x64xf32> to vector<16x64xf32>
    %26 = arith.mulf %5, %25 : vector<16x64xf32>
    %27 = vector.broadcast %24 : vector<1x64xf32> to vector<16x64xf32>
    %28 = arith.addf %26, %27 : vector<16x64xf32>
    %cst_14 = arith.constant 0.000000e+00 : f32
    %29 = vector.broadcast %cst_14 : f32 to vector<16x64xf32>
    %30 = arith.maximumf %28, %29 : vector<16x64xf32>
    %31 = vector.extract_strided_slice %30 {offsets = [0, 0], sizes = [15, 64], strides = [1, 1]} : vector<16x64xf32> to vector<15x64xf32>
    %32 = vector.extract_strided_slice %30 {offsets = [1, 0], sizes = [15, 64], strides = [1, 1]} : vector<16x64xf32> to vector<15x64xf32>
    %33 = arith.maximumf %31, %32 : vector<15x64xf32>
    %c0_15 = arith.constant 0 : index
    %c0_16 = arith.constant 0 : index
    %34 = vector.load %arg5[%c0_15, %c0_16] : memref<8x15xf32, #tpu.memory_space<vmem>>, vector<8x15xf32>
    %cst_17 = arith.constant dense<0.000000e+00> : vector<8x64xf32>
    %35 = tpu.matmul %34, %33, %cst_17 {dimension_numbers = #tpu.dot_dimension_numbers<[1], [0], [0], [1], [0, 0, 1, 1], [], []>} : vector<8x15xf32>, vector<15x64xf32>, vector<8x64xf32> -> vector<8x64xf32>
    %c0_18 = arith.constant 0 : index
    %c0_19 = arith.constant 0 : index
    %36 = vector.load %arg6[%c0_18, %c0_19] : memref<8x64xf32, #tpu.memory_space<vmem>>, vector<8x64xf32>
    tpu.vector_store %arg6[%c0_18, %c0_19], %35 {strides = array<i32>} : memref<8x64xf32, #tpu.memory_space<vmem>>, vector<8x64xf32>,
    return
  }
}

module attributes {stable_mosaic.version = 11 : i64} {
  func.func @conv_bn_relu_pool_kernel(%arg0: memref<4x192xf32, #tpu.memory_space<vmem>>, %arg1: memref<192x64xf32, #tpu.memory_space<vmem>>, %arg2: memref<1x64xf32, #tpu.memory_space<vmem>>, %arg3: memref<1x64xf32, #tpu.memory_space<vmem>>, %arg4: memref<1x64xf32, #tpu.memory_space<vmem>>, %arg5: memref<2x3xf32, #tpu.memory_space<vmem>>, %arg6: memref<2x64xf32, #tpu.memory_space<vmem>>) attributes {dimension_semantics = [], scalar_prefetch = 0 : i64, scratch_operands = 0 : i64, tpu.core_type = #tpu.core_type<tc>} {
    %c0 = arith.constant 0 : index
    %c0_0 = arith.constant 0 : index
    %0 = vector.load %arg0[%c0, %c0_0] : memref<4x192xf32, #tpu.memory_space<vmem>>, vector<4x192xf32>
    %c0_1 = arith.constant 0 : index
    %c0_2 = arith.constant 0 : index
    %1 = vector.load %arg1[%c0_1, %c0_2] : memref<192x64xf32, #tpu.memory_space<vmem>>, vector<192x64xf32>
    %cst = arith.constant dense<0.000000e+00> : vector<4x64xf32>
    %2 = tpu.matmul %0, %1, %cst {dimension_numbers = #tpu.dot_dimension_numbers<[1], [0], [0], [1], [0, 0, 1, 1], [], []>} : vector<4x192xf32>, vector<192x64xf32>, vector<4x64xf32> -> vector<4x64xf32>
    %c0_3 = arith.constant 0 : index
    %c0_4 = arith.constant 0 : index
    %3 = vector.load %arg2[%c0_3, %c0_4] : memref<1x64xf32, #tpu.memory_space<vmem>>, vector<1x64xf32>
    %4 = vector.broadcast %3 : vector<1x64xf32> to vector<4x64xf32>
    %5 = arith.addf %2, %4 : vector<4x64xf32>
    %cst_5 = arith.constant dense<0.000000e+00> : vector<64xf32>
    %6 = vector.multi_reduction <add>, %5, %cst_5 [0] : vector<4x64xf32> to vector<64xf32>
    %7 = vector.shape_cast %6 : vector<64xf32> to vector<1x64xf32>
    %cst_6 = arith.constant 2.500000e-01 : f32
    %8 = vector.broadcast %cst_6 : f32 to vector<1x64xf32>
    %9 = arith.mulf %7, %8 : vector<1x64xf32>
    %10 = arith.mulf %5, %5 : vector<4x64xf32>
    %cst_7 = arith.constant dense<0.000000e+00> : vector<64xf32>
    %11 = vector.multi_reduction <add>, %10, %cst_7 [0] : vector<4x64xf32> to vector<64xf32>
    %12 = vector.shape_cast %11 : vector<64xf32> to vector<1x64xf32>
    %cst_8 = arith.constant 2.500000e-01 : f32
    %13 = vector.broadcast %cst_8 : f32 to vector<1x64xf32>
    %14 = arith.mulf %12, %13 : vector<1x64xf32>
    %15 = arith.mulf %9, %9 : vector<1x64xf32>
    %16 = arith.subf %14, %15 : vector<1x64xf32>
    %c0_9 = arith.constant 0 : index
    %c0_10 = arith.constant 0 : index
    %17 = vector.load %arg3[%c0_9, %c0_10] : memref<1x64xf32, #tpu.memory_space<vmem>>, vector<1x64xf32>
    %cst_11 = arith.constant 9.99999974E-6 : f32
    %18 = vector.broadcast %cst_11 : f32 to vector<1x64xf32>
    %19 = arith.addf %16, %18 : vector<1x64xf32>
    %20 = math.rsqrt %19 : vector<1x64xf32>
    %21 = arith.mulf %17, %20 : vector<1x64xf32>
    %c0_12 = arith.constant 0 : index
    %c0_13 = arith.constant 0 : index
    %22 = vector.load %arg4[%c0_12, %c0_13] : memref<1x64xf32, #tpu.memory_space<vmem>>, vector<1x64xf32>
    %23 = arith.mulf %9, %21 : vector<1x64xf32>
    %24 = arith.subf %22, %23 : vector<1x64xf32>
    %25 = vector.broadcast %21 : vector<1x64xf32> to vector<4x64xf32>
    %26 = arith.mulf %5, %25 : vector<4x64xf32>
    %27 = vector.broadcast %24 : vector<1x64xf32> to vector<4x64xf32>
    %28 = arith.addf %26, %27 : vector<4x64xf32>
    %cst_14 = arith.constant 0.000000e+00 : f32
    %29 = vector.broadcast %cst_14 : f32 to vector<4x64xf32>
    %30 = arith.maximumf %28, %29 : vector<4x64xf32>
    %31 = vector.extract_strided_slice %30 {offsets = [0, 0], sizes = [3, 64], strides = [1, 1]} : vector<4x64xf32> to vector<3x64xf32>
    %32 = vector.extract_strided_slice %30 {offsets = [1, 0], sizes = [3, 64], strides = [1, 1]} : vector<4x64xf32> to vector<3x64xf32>
    %33 = arith.maximumf %31, %32 : vector<3x64xf32>
    %c0_15 = arith.constant 0 : index
    %c0_16 = arith.constant 0 : index
    %34 = vector.load %arg5[%c0_15, %c0_16] : memref<2x3xf32, #tpu.memory_space<vmem>>, vector<2x3xf32>
    %cst_17 = arith.constant dense<0.000000e+00> : vector<2x64xf32>
    %35 = tpu.matmul %34, %33, %cst_17 {dimension_numbers = #tpu.dot_dimension_numbers<[1], [0], [0], [1], [0, 0, 1, 1], [], []>} : vector<2x3xf32>, vector<3x64xf32>, vector<2x64xf32> -> vector<2x64xf32>
    %c0_18 = arith.constant 0 : index
    %c0_19 = arith.constant 0 : index
    %36 = vector.load %arg6[%c0_18, %c0_19] : memref<2x64xf32, #tpu.memory_space<vmem>>, vector<2x64xf32>
    tpu.vector_store %arg6[%c0_18, %c0_19], %35 {strides = array<i32>} : memref<2x64xf32, #tpu.memory_space<vmem>>, vector<2x64xf32>,
    return
  }
}

module attributes {stable_mosaic.version = 11 : i64} {
  func.func @head_kernel(%arg0: memref<2x64xf32, #tpu.memory_space<vmem>>, %arg1: memref<64x100xf32, #tpu.memory_space<vmem>>, %arg2: memref<1x100xf32, #tpu.memory_space<vmem>>, %arg3: memref<100x100xf32, #tpu.memory_space<vmem>>, %arg4: memref<1x100xf32, #tpu.memory_space<vmem>>, %arg5: memref<100x10xf32, #tpu.memory_space<vmem>>, %arg6: memref<1x10xf32, #tpu.memory_space<vmem>>, %arg7: memref<2x10xf32, #tpu.memory_space<vmem>>) attributes {dimension_semantics = [], scalar_prefetch = 0 : i64, scratch_operands = 0 : i64, tpu.core_type = #tpu.core_type<tc>} {
    %c0 = arith.constant 0 : index
    %c0_0 = arith.constant 0 : index
    %0 = vector.load %arg0[%c0, %c0_0] : memref<2x64xf32, #tpu.memory_space<vmem>>, vector<2x64xf32>
    %c0_1 = arith.constant 0 : index
    %c0_2 = arith.constant 0 : index
    %1 = vector.load %arg1[%c0_1, %c0_2] : memref<64x100xf32, #tpu.memory_space<vmem>>, vector<64x100xf32>
    %cst = arith.constant dense<0.000000e+00> : vector<2x100xf32>
    %2 = tpu.matmul %0, %1, %cst {dimension_numbers = #tpu.dot_dimension_numbers<[1], [0], [0], [1], [0, 0, 1, 1], [], []>} : vector<2x64xf32>, vector<64x100xf32>, vector<2x100xf32> -> vector<2x100xf32>
    %c0_3 = arith.constant 0 : index
    %c0_4 = arith.constant 0 : index
    %3 = vector.load %arg2[%c0_3, %c0_4] : memref<1x100xf32, #tpu.memory_space<vmem>>, vector<1x100xf32>
    %4 = vector.broadcast %3 : vector<1x100xf32> to vector<2x100xf32>
    %5 = arith.addf %2, %4 : vector<2x100xf32>
    %cst_5 = arith.constant 0.000000e+00 : f32
    %6 = vector.broadcast %cst_5 : f32 to vector<2x100xf32>
    %7 = arith.maximumf %5, %6 : vector<2x100xf32>
    %c0_6 = arith.constant 0 : index
    %c0_7 = arith.constant 0 : index
    %8 = vector.load %arg3[%c0_6, %c0_7] : memref<100x100xf32, #tpu.memory_space<vmem>>, vector<100x100xf32>
    %cst_8 = arith.constant dense<0.000000e+00> : vector<2x100xf32>
    %9 = tpu.matmul %7, %8, %cst_8 {dimension_numbers = #tpu.dot_dimension_numbers<[1], [0], [0], [1], [0, 0, 1, 1], [], []>} : vector<2x100xf32>, vector<100x100xf32>, vector<2x100xf32> -> vector<2x100xf32>
    %c0_9 = arith.constant 0 : index
    %c0_10 = arith.constant 0 : index
    %10 = vector.load %arg4[%c0_9, %c0_10] : memref<1x100xf32, #tpu.memory_space<vmem>>, vector<1x100xf32>
    %11 = vector.broadcast %10 : vector<1x100xf32> to vector<2x100xf32>
    %12 = arith.addf %9, %11 : vector<2x100xf32>
    %cst_11 = arith.constant 0.000000e+00 : f32
    %13 = vector.broadcast %cst_11 : f32 to vector<2x100xf32>
    %14 = arith.maximumf %12, %13 : vector<2x100xf32>
    %c0_12 = arith.constant 0 : index
    %c0_13 = arith.constant 0 : index
    %15 = vector.load %arg5[%c0_12, %c0_13] : memref<100x10xf32, #tpu.memory_space<vmem>>, vector<100x10xf32>
    %cst_14 = arith.constant dense<0.000000e+00> : vector<2x10xf32>
    %16 = tpu.matmul %14, %15, %cst_14 {dimension_numbers = #tpu.dot_dimension_numbers<[1], [0], [0], [1], [0, 0, 1, 1], [], []>} : vector<2x100xf32>, vector<100x10xf32>, vector<2x10xf32> -> vector<2x10xf32>
    %c0_15 = arith.constant 0 : index
    %c0_16 = arith.constant 0 : index
    %17 = vector.load %arg6[%c0_15, %c0_16] : memref<1x10xf32, #tpu.memory_space<vmem>>, vector<1x10xf32>
    %18 = vector.broadcast %17 : vector<1x10xf32> to vector<2x10xf32>
    %19 = arith.addf %16, %18 : vector<2x10xf32>
    %cst_17 = arith.constant dense<0xFF800000> : vector<2xf32>
    %20 = vector.multi_reduction <maximumf>, %19, %cst_17 [1] : vector<2x10xf32> to vector<2xf32>
    %21 = vector.shape_cast %20 : vector<2xf32> to vector<2x1xf32>
    %22 = vector.broadcast %21 : vector<2x1xf32> to vector<2x10xf32>
    %23 = arith.subf %19, %22 : vector<2x10xf32>
    %24 = math.exp %23 : vector<2x10xf32>
    %cst_18 = arith.constant dense<0.000000e+00> : vector<2xf32>
    %25 = vector.multi_reduction <add>, %24, %cst_18 [1] : vector<2x10xf32> to vector<2xf32>
    %26 = vector.shape_cast %25 : vector<2xf32> to vector<2x1xf32>
    %27 = math.log %26 : vector<2x1xf32>
    %28 = vector.broadcast %27 : vector<2x1xf32> to vector<2x10xf32>
    %29 = arith.subf %23, %28 : vector<2x10xf32>
    %c0_19 = arith.constant 0 : index
    %c0_20 = arith.constant 0 : index
    %30 = vector.load %arg7[%c0_19, %c0_20] : memref<2x10xf32, #tpu.memory_space<vmem>>, vector<2x10xf32>
    tpu.vector_store %arg7[%c0_19, %c0_20], %29 {strides = array<i32>} : memref<2x10xf32, #tpu.memory_space<vmem>>, vector<2x10xf32>,
    return
  }
}

</mosaic_0001>

<bundles_post_ra>
// kernel: wdcnn_forward.7
= control target key start
LH: loop header
LB: loop body
LE: loop exit
PB: predicated region body
PF: predicated region fallthrough
CT: control target
= control target key end

     0   :  { %vm44_vm0 = vcmask 392192   ;;  %vm317_vm1 = vcmask 482304   ;;  %vm174_vm2 = vcmask 261120   ;;  %vm188_vm3 = vcmask 257024   ;;  %s730_s1 = inlined_call_operand.vmem [shape: f32[48,32], index: 1, kind: input, shape index: {}]   ;;  %s731_s0 = inlined_call_operand.vmem [shape: f32[60,48], index: 0, kind: input, shape index: {}]   ;;  %s732_s5 = inlined_call_operand.vmem [shape: f32[30,59], index: 5, kind: input, shape index: {}]   ;;  %s733_s2 = inlined_call_operand.vmem [shape: f32[1,32], index: 2, kind: input, shape index: {}]   ;;  %s734_s3 = inlined_call_operand.vmem [shape: f32[1,32], index: 3, kind: input, shape index: {}]   ;;  %s735_s4 = inlined_call_operand.vmem [shape: f32[1,32], index: 4, kind: input, shape index: {}]   ;;  %s736_s6 = inlined_call_operand.vmem [shape: f32[30,32], index: 6, kind: output, shape index: {}]  }
   0x1   :  { %v31_v0 = vld [vmem:[%s730_s1] sm:$0xff]  ;;  %v32_v1 = vld [vmem:[%s730_s1 + $0x8] sm:$0xff]  ;;  %v33_v2 = vld [vmem:[%s730_s1 + $0x10] sm:$0xff]  ;;  %vm281_vm4 = vcmask 1046528   ;;  %vm330_vm5 = vcmask 1042432   ;;  %vm547_vm6 = vmmov 1  }
   0x2   :  { %v514_v3 = vpack.c.bf16 %v32_v1, %v31_v0  ;;  %v34_v4 = vld [vmem:[%s730_s1 + $0x18] sm:$0xff]  ;;  %v35_v6 = vld [vmem:[%s730_s1 + $0x20] sm:$0xff]  ;;  %v36_v7 = vld [vmem:[%s730_s1 + $0x28] sm:$0xff]  ;;  %vm422_vm8 = vcmask 259072  }
   0x3   :  { %v518_v5 = vpack.c.bf16 %v34_v4, %v33_v2  ;;  %v23_v8 = vld [vmem:[%s731_s0] sm:$0xff]  ;;  %v522_v9 = vpack.c.bf16 %v36_v7, %v35_v6  ;;  %v24_v10 = vld [vmem:[%s731_s0 + $0x8] sm:$0xff]  ;;  %v25_v11 = vld [vmem:[%s731_s0 + $0x10] sm:$0xff] }
   0x4   :  { %515 = vmatprep.subr.bf16.mxu0 %v514_v3  ;;  %480 = vmatprep.mubr.msk.f32.mxu0 %vm44_vm0, %v23_v8  ;;  %v26_v12 = vld [vmem:[%s731_s0 + $0x18] sm:$0xff]  ;;  %v27_v13 = vld [vmem:[%s731_s0 + $0x20] sm:$0xff]  ;;  %v28_v14 = vld [vmem:[%s731_s0 + $0x28] sm:$0xff] }
   0x5   :  { %517 = vmatpush3.bf16.msra.mxu0 %v514_v3  ;;  %v29_v15 = vld [vmem:[%s731_s0 + $0x30] sm:$0xff]  ;;  %v30_v16 = vld [vmem:[%s731_s0 + $0x38] sm:$0xf]  ;;  %v313_v17 = vld [vmem:[%s732_s5] sm:$0xff] }
   0x6   :  { %519 = vmatprep.subr.bf16.mxu0 %v518_v5  ;;  %508 = vmatprep.mubr.msk.f32.mxu1 %vm317_vm1, %v313_v17  ;;  %v428_v18 = vld [vmem:[%s733_s2] ss:$0 sm:$0xff]  ;;  %vm539_vm7 = vmpackc.low %vm330_vm5, %vm547_vm6 }
   0x9   :  { %521 = vmatpush3.bf16.msra.mxu0 %v518_v5 }
   0xa   :  { %523 = vmatprep.subr.bf16.mxu0 %v522_v9 }
   0xd   :  { %525 = vmatpush3.bf16.msra.mxu0 %v522_v9 }
  0x10   :  { %481 = vmatmul.mubr.msk.f32.vlgmr.msra.gmra.mrb[0].mxu0 %vm44_vm0, %v24_v10 }
  0x11   :  { %483 = vmatprep.mubr.msk.f32.mxu0 %vm44_vm0, %v25_v11 }
  0x14   :  { %484 = vmatmul.mubr.msk.f32.gmra.mrb[2].mxu0 %vm44_vm0, %v26_v12 }
  0x15   :  { %486 = vmatprep.mubr.msk.f32.mxu0 %vm44_vm0, %v27_v13 }
  0x18   :  { %487 = vmatmul.mubr.msk.f32.gmra.mrb[4].mxu0 %vm44_vm0, %v28_v14 }
  0x19   :  { %489 = vmatprep.mubr.msk.f32.mxu0 %vm44_vm0, %v29_v15 }
  0x1c   :  { %490 = vmatmul.mubr.msk.f32.gmra.mrb[6].mxu0 %vm44_vm0, %v30_v16 }
  0xe3   :  { %v482_v19 = vpop.f32.mrb[0].mxu0 }
  0xe4   :  { %v640_v20 = vadd.f32 %v482_v19, %v428_v18  ;;  %v135_v21 = vpop.f32.mrb[1].mxu0 }
  0xe5   :  { %v642_v22 = vadd.f32 %v428_v18, %v135_v21 }
  0xe6   :  { %v176_v23 = vsel %vm174_vm2, %v640_v20, 0.0  ;;  %v199_v24 = vmul.f32 %v640_v20, %v640_v20 }
  0xe7   :  { %v175_v25 = vsel %vm174_vm2, %v642_v22, 0.0  ;;  %v198_v26 = vmul.f32 %v642_v22, %v642_v22  ;;  %v485_v27 = vpop.f32.mrb[2].mxu0 }
  0xe8   :  { %v207_v28 = vsel %vm174_vm2, %v199_v24, 0.0  ;;  %v177_v29 = vadd.f32 %v176_v23, %v175_v25  ;;  %v653_v30 = vadd.f32 %v485_v27, %v428_v18  ;;  %v145_v31 = vpop.f32.mrb[3].mxu0 }
  0xe9   :  { %v206_v32 = vsel %vm174_vm2, %v198_v26, 0.0  ;;  %v656_v33 = vadd.f32 %v428_v18, %v145_v31  ;;  %v230_v31 = vld [vmem:[%s734_s3] sm:$0x1] }
  0xea   :  { %v208_v34 = vadd.f32 %v207_v28, %v206_v32  ;;  %v201_v35 = vmul.f32 %v653_v30, %v653_v30  ;;  %v180_v42 = vsel %vm174_vm2, %v653_v30, 0.0  ;;  %v238_v28 = vlaneseq }
  0xeb   :  { %v178_v36 = vsel %vm174_vm2, %v656_v33, 0.0  ;;  %v200_v37 = vmul.f32 %v656_v33, %v656_v33  ;;  %v488_v38 = vpop.f32.mrb[4].mxu0 }
  0xec   :  { %v179_v39 = vadd.f32 %v178_v36, %v177_v29  ;;  %v664_v40 = vadd.f32 %v488_v38, %v428_v18  ;;  %v155_v41 = vpop.f32.mrb[5].mxu0  ;;  %v211_v47 = vsel %vm174_vm2, %v201_v35, 0.0  ;;  %v239_v29 = vshrl.u32 %v238_v28, 7  ;;  %v234_v36 = vld [vmem:[%s735_s4] sm:$0x1] }
  0xed   :  { %v209_v43 = vsel %vm174_vm2, %v200_v37, 0.0  ;;  %v669_v44 = vadd.f32 %v428_v18, %v155_v41  ;;  %v316_v28 = vld [vmem:[%s732_s5 + $0x18] sm:$0x3f] }
  0xee   :  { %v210_v45 = vadd.f32 %v209_v43, %v208_v34  ;;  %v181_v46 = vadd.f32 %v180_v42, %v179_v39  ;;  %v203_v48 = vmul.f32 %v664_v40, %v664_v40  ;;  %v184_v56 = vsel %vm174_vm2, %v664_v40, 0.0 }
  0xef   :  { %v182_v49 = vsel %vm174_vm2, %v669_v44, 0.0  ;;  %v202_v50 = vmul.f32 %v669_v44, %v669_v44  ;;  %v491_v51 = vpop.f32.mrb[6].mxu0  ;;  %v240_v32 = vsub.s32 0, %v239_v29 }
  0xf0   :  { %v183_v52 = vadd.f32 %v182_v49, %v181_v46  ;;  %v212_v53 = vadd.f32 %v211_v47, %v210_v45  ;;  %v171_v54 = vadd.f32 %v491_v51, %v428_v18  ;;  %v165_v55 = vpop.f32.mrb[7].mxu0  ;;  %v215_v61 = vsel %vm174_vm2, %v203_v48, 0.0 }
  0xf1   :  { %v213_v57 = vsel %vm174_vm2, %v202_v50, 0.0  ;;  %v166_v58 = vadd.f32 %v428_v18, %v165_v55 }
  0xf2   :  { %v214_v59 = vadd.f32 %v213_v57, %v212_v53  ;;  %v185_v60 = vadd.f32 %v184_v56, %v183_v52  ;;  %v205_v62 = vmul.f32 %v171_v54, %v171_v54  ;;  %v189_v3 = vsel %vm188_vm3, %v171_v54, 0.0 }
  0xf3   :  { %v186_v63 = vsel %vm174_vm2, %v166_v58, 0.0  ;;  %v204_v0 = vmul.f32 %v166_v58, %v166_v58 }
  0xf4   :  { %v187_v1 = vadd.f32 %v186_v63, %v185_v60  ;;  %v216_v2 = vadd.f32 %v215_v61, %v214_v59  ;;  %v219_v7 = vsel %vm188_vm3, %v205_v62, 0.0 }
  0xf5   :  { %v217_v4 = vsel %vm174_vm2, %v204_v0, 0.0 }
  0xf6   :  { %v190_v5 = vadd.f32 %v189_v3, %v187_v1  ;;  %v218_v6 = vadd.f32 %v217_v4, %v216_v2 }
  0xf8   :  { %v191_v8 = vrot.slane %v190_v5, 4  ;;  %v220_v9 = vadd.f32 %v219_v7, %v218_v6 }
  0xfa   :  { %v192_v10 = vadd.f32 %v191_v8, %v190_v5  ;;  %v221_v11 = vrot.slane %v220_v9, 4 }
  0xfc   :  { %v193_v12 = vrot.slane %v192_v10, 2  ;;  %v222_v13 = vadd.f32 %v221_v11, %v220_v9 }
  0xfe   :  { %v194_v14 = vadd.f32 %v193_v12, %v192_v10  ;;  %v223_v15 = vrot.slane %v222_v13, 2 }
 0x100   :  { %v195_v16 = vrot.slane %v194_v14, 1  ;;  %v224_v17 = vadd.f32 %v223_v15, %v222_v13 }
 0x102   :  { %v196_v18 = vadd.f32 %v195_v16, %v194_v14  ;;  %v225_v19 = vrot.slane %v224_v17, 1 }
 0x104   :  { %v197_v21 = vmul.f32 0.016666668, %v196_v18  ;;  %v226_v23 = vadd.f32 %v225_v19, %v224_v17 }
 0x106   :  { %v227_v24 = vmul.f32 0.016666668, %v226_v23  ;;  %v228_v25 = vmul.f32 %v197_v21, %v197_v21 }
 0x108   :  { %v229_v26 = vsub.f32 %v227_v24, %v228_v25 }
 0x10a   :  { %v231_v27 = vadd.f32 1e-05, %v229_v26  ;;  %v314_v26 = vld [vmem:[%s732_s5 + $0x8] sm:$0xff] }
 0x10c   :  { %545 = vrsqrt.f32 %v231_v27  ;;  %v315_v27 = vld [vmem:[%s732_s5 + $0x10] sm:$0xff] }
 0x116   :  { %v546_v34 = vpop.eup %545 }
 0x117   :  { %v233_v35 = vmul.f32 %v546_v34, %v230_v31 }
 0x119   :  { %v235_v37 = vmul.f32 %v233_v35, %v197_v21  ;;  %v241_v38 = vrot.slane %v233_v35, %v240_v32 }
 0x11b   :  { %v236_v39 = vsub.f32 %v234_v36, %v235_v37  ;;  %v249_v41 = vmul.f32 %v241_v38, %v166_v58  ;;  %v243_v42 = vmul.f32 %v241_v38, %v642_v22  ;;  %v244_v43 = vmul.f32 %v241_v38, %v640_v20 }
 0x11c   :  { %v245_v45 = vmul.f32 %v241_v38, %v656_v33  ;;  %v246_v46 = vmul.f32 %v241_v38, %v653_v30  ;;  %v247_v47 = vmul.f32 %v241_v38, %v669_v44  ;;  %v248_v48 = vmul.f32 %v241_v38, %v664_v40 }
 0x11d   :  { %v255_v49 = vrot.slane %v236_v39, %v240_v32  ;;  %v250_v50 = vmul.f32 %v241_v38, %v171_v54 }
 0x11f   :  { %v263_v51 = vadd.f32 %v255_v49, %v249_v41  ;;  %v257_v52 = vadd.f32 %v255_v49, %v243_v42  ;;  %v258_v53 = vadd.f32 %v255_v49, %v244_v43  ;;  %v259_v55 = vadd.f32 %v255_v49, %v245_v45 }
 0x120   :  { %v260_v56 = vadd.f32 %v255_v49, %v246_v46  ;;  %v261_v57 = vadd.f32 %v255_v49, %v247_v47  ;;  %v262_v22 = vadd.f32 %v255_v49, %v248_v48  ;;  %v264_v58 = vadd.f32 %v255_v49, %v250_v50 }
 0x121   :  { %v271_v20 = vmax.f32 %v263_v51, 0.0  ;;  %v265_v59 = vmax.f32 %v257_v52, 0.0  ;;  %v266_v33 = vmax.f32 %v258_v53, 0.0  ;;  %v267_v60 = vmax.f32 %v259_v55, 0.0 }
 0x122   :  { %v268_v30 = vmax.f32 %v260_v56, 0.0  ;;  %v269_v61 = vmax.f32 %v261_v57, 0.0  ;;  %v270_v44 = vmax.f32 %v262_v22, 0.0  ;;  %v272_v62 = vmax.f32 %v264_v58, 0.0 }
 0x123   :  { %v293_v40 = vrot.slane %v271_v20, 1  ;;  %v282_v63 = vrot.slane %v265_v59, 1  ;;  %v283_v54 = vrot.slane %v266_v33, 1  ;;  %v285_v0 = vrot.slane %v267_v60, 1 }
 0x124   :  { %v287_v1 = vrot.slane %v268_v30, 1  ;;  %v289_v2 = vrot.slane %v269_v61, 1  ;;  %v291_v3 = vrot.slane %v270_v44, 1  ;;  %v295_v4 = vrot.slane %v272_v62, 1 }
 0x125   :  { %v284_v5 = vsel %vm281_vm4, %v282_v63, %v283_v54  ;;  %v286_v6 = vsel %vm281_vm4, %v283_v54, %v285_v0 }
 0x126   :  { %v305_v7 = vmax.f32 %v265_v59, %v284_v5  ;;  %v306_v8 = vmax.f32 %v266_v33, %v286_v6  ;;  %v288_v9 = vsel %vm281_vm4, %v285_v0, %v287_v1  ;;  %v290_v10 = vsel %vm281_vm4, %v287_v1, %v289_v2 }
 0x127   :  { %v307_v11 = vmax.f32 %v267_v60, %v288_v9  ;;  %v308_v12 = vmax.f32 %v268_v30, %v290_v10  ;;  %v292_v13 = vsel %vm281_vm4, %v289_v2, %v291_v3  ;;  %v294_v14 = vsel %vm281_vm4, %v291_v3, %v293_v40 }
 0x128   :  { %v526_v15 = vpack.c.bf16 %v306_v8, %v305_v7  ;;  %v309_v16 = vmax.f32 %v269_v61, %v292_v13  ;;  %v310_v17 = vmax.f32 %v270_v44, %v294_v14  ;;  %v296_v18 = vsel %vm281_vm4, %v293_v40, %v295_v4 }
 0x129   :  { %v530_v19 = vpack.c.bf16 %v308_v12, %v307_v11  ;;  %v311_v21 = vmax.f32 %v271_v20, %v296_v18  ;;  %v312_v23 = vmax.f32 %v272_v62, %v295_v4 }
 0x12a   :  { %527 = vmatprep.subr.bf16.mxu1 %v526_v15  ;;  %v534_v24 = vpack.c.bf16 %v310_v17, %v309_v16 }
 0x12b   :  { %529 = vmatpush3.bf16.msra.mxu1 %v526_v15  ;;  %v538_v25 = vpack.c.bf16 %v312_v23, %v311_v21 }
 0x12c   :  { %531 = vmatprep.subr.bf16.mxu1 %v530_v19 }
 0x12f   :  { %533 = vmatpush3.bf16.msra.mxu1 %v530_v19 }
 0x130   :  { %535 = vmatprep.subr.bf16.mxu1 %v534_v24 }
 0x133   :  { %537 = vmatpush3.bf16.msra.mxu1 %v534_v24 }
 0x134   :  { %540 = vmatprep.subr.msk.bf16.mxu1 %vm539_vm7, %v538_v25 }
 0x137   :  { %543 = vmatpush3.bf16.msk.msra.mxu1 %vm539_vm7, %v538_v25 }
 0x13a   :  { %509 = vmatmul.mubr.msk.f32.vlgmr.msra.gmra.mrb[0].mxu1 %vm317_vm1, %v314_v26 }
 0x13b   :  { %511 = vmatprep.mubr.msk.f32.mxu1 %vm317_vm1, %v315_v27 }
 0x13e   :  { %512 = vmatmul.mubr.msk.f32.gmra.mrb[2].mxu1 %vm317_vm1, %v316_v28 }
 0x20d   :  { %v510_v29 = vpop.f32.mrb[0].mxu1 }
 0x20e   :  { %420 = vst.msk [vmem:[%s736_s6 + $0x8] sm:$0xff] %vm174_vm2, %v510_v29  ;;  %v400_v31 = vpop.f32.mrb[1].mxu1 }
 0x20f   :  { %419 = vst.msk [vmem:[%s736_s6] sm:$0xff] %vm174_vm2, %v400_v31 }
 0x211   :  { %v513_v32 = vpop.f32.mrb[2].mxu1 }
 0x212   :  { %423 = vst.msk [vmem:[%s736_s6 + $0x18] sm:$0x3f] %vm422_vm8, %v513_v32  ;;  %v410_v34 = vpop.f32.mrb[3].mxu1 }
 0x213   :  { %421 = vst.msk [vmem:[%s736_s6 + $0x10] sm:$0xff] %vm174_vm2, %v410_v34 }

// kernel: wdcnn_forward.6
= control target key start
LH: loop header
LB: loop body
LE: loop exit
PB: predicated region body
PF: predicated region fallthrough
CT: control target
= control target key end

     0   :  { %vm458_vm0 = vcmask 990208   ;;  %vm207_vm1 = vcmask 130048   ;;  %vm237_vm2 = vcmask 123904   ;;  %vm386_vm3 = vcmask 1046528   ;;  %s1240_s1 = inlined_call_operand.vmem [shape: f32[128,16], index: 1, kind: input, shape index: {}]   ;;  %s1241_s0 = inlined_call_operand.vmem [shape: f32[122,128], index: 0, kind: input, shape index: {}]   ;;  %s1242_s5 = inlined_call_operand.vmem [shape: f32[60,121], index: 5, kind: input, shape index: {}]   ;;  %s1243_s2 = inlined_call_operand.vmem [shape: f32[1,16], index: 2, kind: input, shape index: {}]   ;;  %s1244_s3 = inlined_call_operand.vmem [shape: f32[1,16], index: 3, kind: input, shape index: {}]   ;;  %s1245_s4 = inlined_call_operand.vmem [shape: f32[1,16], index: 4, kind: input, shape index: {}]   ;;  %s1246_s6 = inlined_call_operand.vmem [shape: f32[60,16], index: 6, kind: output, shape index: {}]  }
   0x1   :  { %v39_v0 = vld [vmem:[%s1240_s1] sm:$0xff]  ;;  %v40_v1 = vld [vmem:[%s1240_s1 + $0x8] sm:$0xff]  ;;  %v41_v2 = vld [vmem:[%s1240_s1 + $0x10] sm:$0xff]  ;;  %vm483_vm4 = vcmask 1040384   ;;  %vm840_vm5 = vmmov 1   ;;  %vm599_vm7 = vcmask 125952  }
   0x2   :  { %v771_v3 = vpack.c.bf16 %v40_v1, %v39_v0  ;;  %v42_v4 = vld [vmem:[%s1240_s1 + $0x18] sm:$0xff]  ;;  %v43_v6 = vld [vmem:[%s1240_s1 + $0x20] sm:$0xff]  ;;  %v44_v7 = vld [vmem:[%s1240_s1 + $0x28] sm:$0xff] }
   0x3   :  { %v775_v5 = vpack.c.bf16 %v42_v4, %v41_v2  ;;  %v779_v8 = vpack.c.bf16 %v44_v7, %v43_v6  ;;  %v23_v9 = vld [vmem:[%s1241_s0] sm:$0xff]  ;;  %v45_v10 = vld [vmem:[%s1240_s1 + $0x30] sm:$0xff]  ;;  %v46_v11 = vld [vmem:[%s1240_s1 + $0x38] sm:$0xff] }
   0x4   :  { %772 = vmatprep.subr.bf16.mxu0 %v771_v3  ;;  %703 = vmatprep.mubr.f32.mxu0 %v23_v9  ;;  %v783_v12 = vpack.c.bf16 %v46_v11, %v45_v10  ;;  %v47_v13 = vld [vmem:[%s1240_s1 + $0x40] sm:$0xff]  ;;  %v48_v14 = vld [vmem:[%s1240_s1 + $0x48] sm:$0xff]  ;;  %v49_v16 = vld [vmem:[%s1240_s1 + $0x50] sm:$0xff] }
   0x5   :  { %774 = vmatpush3.bf16.msra.mxu0 %v771_v3  ;;  %v787_v15 = vpack.c.bf16 %v48_v14, %v47_v13  ;;  %v50_v17 = vld [vmem:[%s1240_s1 + $0x58] sm:$0xff]  ;;  %v51_v19 = vld [vmem:[%s1240_s1 + $0x60] sm:$0xff]  ;;  %v52_v20 = vld [vmem:[%s1240_s1 + $0x68] sm:$0xff] }
   0x6   :  { %776 = vmatprep.subr.bf16.mxu0 %v775_v5  ;;  %v791_v18 = vpack.c.bf16 %v50_v17, %v49_v16  ;;  %v795_v21 = vpack.c.bf16 %v52_v20, %v51_v19  ;;  %v53_v22 = vld [vmem:[%s1240_s1 + $0x70] sm:$0xff]  ;;  %v54_v23 = vld [vmem:[%s1240_s1 + $0x78] sm:$0xff]  ;;  %v24_v25 = vld [vmem:[%s1241_s0 + $0x8] sm:$0xff] }
   0x7   :  { %v799_v24 = vpack.c.bf16 %v54_v23, %v53_v22  ;;  %v25_v26 = vld [vmem:[%s1241_s0 + $0x10] sm:$0xff]  ;;  %v26_v27 = vld [vmem:[%s1241_s0 + $0x18] sm:$0xff]  ;;  %v27_v28 = vld [vmem:[%s1241_s0 + $0x20] sm:$0xff] }
   0x8   :  { %v28_v29 = vld [vmem:[%s1241_s0 + $0x28] sm:$0xff]  ;;  %v29_v30 = vld [vmem:[%s1241_s0 + $0x30] sm:$0xff]  ;;  %v30_v31 = vld [vmem:[%s1241_s0 + $0x38] sm:$0xff] }
   0x9   :  { %778 = vmatpush3.bf16.msra.mxu0 %v775_v5  ;;  %v31_v32 = vld [vmem:[%s1241_s0 + $0x40] sm:$0xff]  ;;  %v32_v33 = vld [vmem:[%s1241_s0 + $0x48] sm:$0xff]  ;;  %v33_v34 = vld [vmem:[%s1241_s0 + $0x50] sm:$0xff] }
   0xa   :  { %780 = vmatprep.subr.bf16.mxu0 %v779_v8  ;;  %v34_v35 = vld [vmem:[%s1241_s0 + $0x58] sm:$0xff]  ;;  %v35_v36 = vld [vmem:[%s1241_s0 + $0x60] sm:$0xff]  ;;  %v36_v37 = vld [vmem:[%s1241_s0 + $0x68] sm:$0xff] }
   0xb   :  { %v37_v38 = vld [vmem:[%s1241_s0 + $0x70] sm:$0xff]  ;;  %v38_v39 = vld [vmem:[%s1241_s0 + $0x78] sm:$0x3]  ;;  %v450_v40 = vld [vmem:[%s1242_s5] sm:$0xff] }
   0xc   :  { %759 = vmatprep.mubr.msk.f32.mxu1 %vm458_vm0, %v450_v40  ;;  %v979_v41 = vld [vmem:[%s1243_s2] ss:$0 sm:$0xff]  ;;  %vm832_vm6 = vmpackc.low %vm483_vm4, %vm840_vm5 }
   0xd   :  { %782 = vmatpush3.bf16.msra.mxu0 %v779_v8 }
   0xe   :  { %784 = vmatprep.subr.bf16.mxu0 %v783_v12 }
  0x11   :  { %786 = vmatpush3.bf16.msra.mxu0 %v783_v12 }
  0x12   :  { %788 = vmatprep.subr.bf16.mxu0 %v787_v15 }
  0x15   :  { %790 = vmatpush3.bf16.msra.mxu0 %v787_v15 }
  0x16   :  { %792 = vmatprep.subr.bf16.mxu0 %v791_v18 }
  0x19   :  { %794 = vmatpush3.bf16.msra.mxu0 %v791_v18 }
  0x1a   :  { %796 = vmatprep.subr.bf16.mxu0 %v795_v21 }
  0x1d   :  { %798 = vmatpush3.bf16.msra.mxu0 %v795_v21 }
  0x1e   :  { %800 = vmatprep.subr.bf16.mxu0 %v799_v24 }
  0x21   :  { %802 = vmatpush3.bf16.msra.mxu0 %v799_v24 }
  0x24   :  { %704 = vmatmul.mubr.f32.vlgmr.msra.gmra.mrb[0].mxu0 %v24_v25 }
  0x25   :  { %706 = vmatprep.mubr.f32.mxu0 %v25_v26 }
  0x28   :  { %707 = vmatmul.mubr.f32.gmra.mrb[2].mxu0 %v26_v27 }
  0x29   :  { %709 = vmatprep.mubr.f32.mxu0 %v27_v28 }
  0x2c   :  { %710 = vmatmul.mubr.f32.gmra.mrb[4].mxu0 %v28_v29 }
  0x2d   :  { %712 = vmatprep.mubr.f32.mxu0 %v29_v30 }
  0x30   :  { %713 = vmatmul.mubr.f32.gmra.mrb[6].mxu0 %v30_v31 }
  0x31   :  { %715 = vmatprep.mubr.f32.mxu0 %v31_v32 }
  0x34   :  { %716 = vmatmul.mubr.f32.gmra.mrb[8].mxu0 %v32_v33 }
  0x35   :  { %718 = vmatprep.mubr.f32.mxu0 %v33_v34 }
  0x38   :  { %719 = vmatmul.mubr.f32.gmra.mrb[10].mxu0 %v34_v35 }
  0x39   :  { %721 = vmatprep.mubr.f32.mxu0 %v35_v36 }
  0x3c   :  { %722 = vmatmul.mubr.f32.gmra.mrb[12].mxu0 %v36_v37 }
  0x3d   :  { %724 = vmatprep.mubr.f32.mxu0 %v37_v38 }
  0x40   :  { %725 = vmatmul.mubr.f32.gmra.mrb[14].mxu0 %v38_v39 }
  0xf7   :  { %v705_v42 = vpop.f32.mrb[0].mxu0 }
  0xf8   :  { %v982_v43 = vadd.f32 %v705_v42, %v979_v41  ;;  %v128_v44 = vpop.f32.mrb[1].mxu0 }
  0xf9   :  { %v985_v45 = vadd.f32 %v979_v41, %v128_v44 }
  0xfa   :  { %v248_v46 = vmul.f32 %v982_v43, %v982_v43  ;;  %v209_v47 = vsel %vm207_vm1, %v982_v43, 0.0 }
  0xfb   :  { %v208_v48 = vsel %vm207_vm1, %v985_v45, 0.0  ;;  %v247_v49 = vmul.f32 %v985_v45, %v985_v45  ;;  %v708_v50 = vpop.f32.mrb[2].mxu0 }
  0xfc   :  { %v996_v51 = vadd.f32 %v708_v50, %v979_v41  ;;  %v138_v52 = vpop.f32.mrb[3].mxu0  ;;  %v264_v53 = vsel %vm207_vm1, %v248_v46, 0.0  ;;  %v210_v56 = vadd.f32 %v209_v47, %v208_v48 }
  0xfd   :  { %v263_v54 = vsel %vm207_vm1, %v247_v49, 0.0  ;;  %v1001_v55 = vadd.f32 %v979_v41, %v138_v52 }
  0xfe   :  { %v250_v57 = vmul.f32 %v996_v51, %v996_v51  ;;  %v265_v61 = vadd.f32 %v264_v53, %v263_v54  ;;  %v213_v1 = vsel %vm207_vm1, %v996_v51, 0.0 }
  0xff   :  { %v211_v58 = vsel %vm207_vm1, %v1001_v55, 0.0  ;;  %v249_v59 = vmul.f32 %v1001_v55, %v1001_v55  ;;  %v711_v60 = vpop.f32.mrb[4].mxu0 }
 0x100   :  { %v212_v62 = vadd.f32 %v211_v58, %v210_v56  ;;  %v1010_v63 = vadd.f32 %v711_v60, %v979_v41  ;;  %v148_v0 = vpop.f32.mrb[5].mxu0  ;;  %v268_v6 = vsel %vm207_vm1, %v250_v57, 0.0 }
 0x101   :  { %v266_v2 = vsel %vm207_vm1, %v249_v59, 0.0  ;;  %v1016_v3 = vadd.f32 %v979_v41, %v148_v0 }
 0x102   :  { %v267_v4 = vadd.f32 %v266_v2, %v265_v61  ;;  %v214_v5 = vadd.f32 %v213_v1, %v212_v62  ;;  %v252_v7 = vmul.f32 %v1010_v63, %v1010_v63  ;;  %v217_v15 = vsel %vm207_vm1, %v1010_v63, 0.0 }
 0x103   :  { %v215_v8 = vsel %vm207_vm1, %v1016_v3, 0.0  ;;  %v251_v9 = vmul.f32 %v1016_v3, %v1016_v3  ;;  %v714_v10 = vpop.f32.mrb[6].mxu0 }
 0x104   :  { %v216_v11 = vadd.f32 %v215_v8, %v214_v5  ;;  %v269_v12 = vadd.f32 %v268_v6, %v267_v4  ;;  %v1026_v13 = vadd.f32 %v714_v10, %v979_v41  ;;  %v158_v14 = vpop.f32.mrb[7].mxu0  ;;  %v272_v20 = vsel %vm207_vm1, %v252_v7, 0.0 }
 0x105   :  { %v270_v16 = vsel %vm207_vm1, %v251_v9, 0.0  ;;  %v1032_v17 = vadd.f32 %v979_v41, %v158_v14 }
 0x106   :  { %v271_v18 = vadd.f32 %v270_v16, %v269_v12  ;;  %v218_v19 = vadd.f32 %v217_v15, %v216_v11  ;;  %v254_v21 = vmul.f32 %v1026_v13, %v1026_v13  ;;  %v221_v29 = vsel %vm207_vm1, %v1026_v13, 0.0 }
 0x107   :  { %v219_v22 = vsel %vm207_vm1, %v1032_v17, 0.0  ;;  %v253_v23 = vmul.f32 %v1032_v17, %v1032_v17  ;;  %v717_v24 = vpop.f32.mrb[8].mxu0 }
 0x108   :  { %v220_v25 = vadd.f32 %v219_v22, %v218_v19  ;;  %v273_v26 = vadd.f32 %v272_v20, %v271_v18  ;;  %v1042_v27 = vadd.f32 %v717_v24, %v979_v41  ;;  %v168_v28 = vpop.f32.mrb[9].mxu0  ;;  %v276_v34 = vsel %vm207_vm1, %v254_v21, 0.0 }
 0x109   :  { %v274_v30 = vsel %vm207_vm1, %v253_v23, 0.0  ;;  %v1048_v31 = vadd.f32 %v979_v41, %v168_v28 }
 0x10a   :  { %v275_v32 = vadd.f32 %v274_v30, %v273_v26  ;;  %v222_v33 = vadd.f32 %v221_v29, %v220_v25  ;;  %v256_v35 = vmul.f32 %v1042_v27, %v1042_v27  ;;  %v225_v46 = vsel %vm207_vm1, %v1042_v27, 0.0 }
 0x10b   :  { %v223_v36 = vsel %vm207_vm1, %v1048_v31, 0.0  ;;  %v255_v37 = vmul.f32 %v1048_v31, %v1048_v31  ;;  %v720_v38 = vpop.f32.mrb[10].mxu0 }
 0x10c   :  { %v224_v39 = vadd.f32 %v223_v36, %v222_v33  ;;  %v277_v40 = vadd.f32 %v276_v34, %v275_v32  ;;  %v1058_v42 = vadd.f32 %v720_v38, %v979_v41  ;;  %v178_v44 = vpop.f32.mrb[11].mxu0  ;;  %v280_v52 = vsel %vm207_vm1, %v256_v35, 0.0 }
 0x10d   :  { %v278_v47 = vsel %vm207_vm1, %v255_v37, 0.0  ;;  %v1064_v48 = vadd.f32 %v979_v41, %v178_v44 }
 0x10e   :  { %v279_v49 = vadd.f32 %v278_v47, %v277_v40  ;;  %v226_v50 = vadd.f32 %v225_v46, %v224_v39  ;;  %v258_v53 = vmul.f32 %v1058_v42, %v1058_v42  ;;  %v229_v62 = vsel %vm207_vm1, %v1058_v42, 0.0 }
 0x10f   :  { %v227_v54 = vsel %vm207_vm1, %v1064_v48, 0.0  ;;  %v257_v56 = vmul.f32 %v1064_v48, %v1064_v48  ;;  %v723_v57 = vpop.f32.mrb[12].mxu0 }
 0x110   :  { %v228_v58 = vadd.f32 %v227_v54, %v226_v50  ;;  %v281_v59 = vadd.f32 %v280_v52, %v279_v49  ;;  %v1074_v60 = vadd.f32 %v723_v57, %v979_v41  ;;  %v188_v61 = vpop.f32.mrb[13].mxu0  ;;  %v284_v5 = vsel %vm207_vm1, %v258_v53, 0.0 }
 0x111   :  { %v282_v0 = vsel %vm207_vm1, %v257_v56, 0.0  ;;  %v1080_v1 = vadd.f32 %v979_v41, %v188_v61  ;;  %v303_v61 = vld [vmem:[%s1244_s3] sm:$0x1] }
 0x112   :  { %v283_v2 = vadd.f32 %v282_v0, %v281_v59  ;;  %v230_v4 = vadd.f32 %v229_v62, %v228_v58  ;;  %v260_v6 = vmul.f32 %v1074_v60, %v1074_v60  ;;  %v233_v15 = vsel %vm207_vm1, %v1074_v60, 0.0 }
 0x113   :  { %v231_v7 = vsel %vm207_vm1, %v1080_v1, 0.0  ;;  %v259_v8 = vmul.f32 %v1080_v1, %v1080_v1  ;;  %v726_v9 = vpop.f32.mrb[14].mxu0  ;;  %v311_v58 = vlaneseq }
 0x114   :  { %v232_v10 = vadd.f32 %v231_v7, %v230_v4  ;;  %v285_v11 = vadd.f32 %v284_v5, %v283_v2  ;;  %v1090_v12 = vadd.f32 %v726_v9, %v979_v41  ;;  %v198_v14 = vpop.f32.mrb[15].mxu0  ;;  %v288_v21 = vsel %vm207_vm1, %v260_v6, 0.0  ;;  %v307_v4 = vld [vmem:[%s1245_s4] sm:$0x1] }
 0x115   :  { %v286_v16 = vsel %vm207_vm1, %v259_v8, 0.0  ;;  %v199_v18 = vadd.f32 %v979_v41, %v198_v14  ;;  %v312_v59 = vshrl.u32 %v311_v58, 7 }
 0x116   :  { %v287_v19 = vadd.f32 %v286_v16, %v285_v11  ;;  %v234_v20 = vadd.f32 %v233_v15, %v232_v10  ;;  %v262_v22 = vmul.f32 %v1090_v12, %v1090_v12  ;;  %v238_v28 = vsel %vm237_vm2, %v1090_v12, 0.0 }
 0x117   :  { %v235_v23 = vsel %vm207_vm1, %v199_v18, 0.0  ;;  %v261_v24 = vmul.f32 %v199_v18, %v199_v18  ;;  %v313_v62 = vsub.s32 0, %v312_v59 }
 0x118   :  { %v236_v25 = vadd.f32 %v235_v23, %v234_v20  ;;  %v289_v26 = vadd.f32 %v288_v21, %v287_v19  ;;  %v292_v41 = vsel %vm237_vm2, %v262_v22, 0.0 }
 0x119   :  { %v290_v29 = vsel %vm207_vm1, %v261_v24, 0.0 }
 0x11a   :  { %v239_v30 = vadd.f32 %v238_v28, %v236_v25  ;;  %v291_v32 = vadd.f32 %v290_v29, %v289_v26 }
 0x11c   :  { %v240_v33 = vrot.slane %v239_v30, 4  ;;  %v293_v34 = vadd.f32 %v292_v41, %v291_v32 }
 0x11e   :  { %v241_v35 = vadd.f32 %v240_v33, %v239_v30  ;;  %v294_v36 = vrot.slane %v293_v34, 4 }
 0x120   :  { %v242_v37 = vrot.slane %v241_v35, 2  ;;  %v295_v38 = vadd.f32 %v294_v36, %v293_v34 }
 0x122   :  { %v243_v39 = vadd.f32 %v242_v37, %v241_v35  ;;  %v296_v40 = vrot.slane %v295_v38, 2 }
 0x124   :  { %v244_v44 = vrot.slane %v243_v39, 1  ;;  %v297_v46 = vadd.f32 %v296_v40, %v295_v38 }
 0x126   :  { %v245_v47 = vadd.f32 %v244_v44, %v243_v39  ;;  %v298_v49 = vrot.slane %v297_v46, 1 }
 0x128   :  { %v246_v50 = vmul.f32 0.008196721, %v245_v47  ;;  %v299_v52 = vadd.f32 %v298_v49, %v297_v46 }
 0x12a   :  { %v300_v53 = vmul.f32 0.008196721, %v299_v52  ;;  %v301_v54 = vmul.f32 %v246_v50, %v246_v50 }
 0x12c   :  { %v302_v56 = vsub.f32 %v300_v53, %v301_v54 }
 0x12e   :  { %v304_v57 = vadd.f32 1e-05, %v302_v56 }
 0x130   :  { %838 = vrsqrt.f32 %v304_v57 }
 0x13a   :  { %v839_v0 = vpop.eup %838 }
 0x13b   :  { %v306_v2 = vmul.f32 %v839_v0, %v303_v61 }
 0x13d   :  { %v308_v5 = vmul.f32 %v306_v2, %v246_v50  ;;  %v1108_v6 = vrot.slane %v306_v2, %v313_v62 }
 0x13f   :  { %v309_v7 = vsub.f32 %v307_v4, %v308_v5  ;;  %v330_v8 = vmul.f32 %v1108_v6, %v199_v18  ;;  %v316_v9 = vmul.f32 %v1108_v6, %v985_v45  ;;  %v317_v10 = vmul.f32 %v1108_v6, %v982_v43 }
 0x140   :  { %v318_v11 = vmul.f32 %v1108_v6, %v1001_v55  ;;  %v319_v14 = vmul.f32 %v1108_v6, %v996_v51  ;;  %v320_v15 = vmul.f32 %v1108_v6, %v1016_v3  ;;  %v321_v16 = vmul.f32 %v1108_v6, %v1010_v63 }
 0x141   :  { %v1123_v19 = vrot.slane %v309_v7, %v313_v62  ;;  %v322_v45 = vmul.f32 %v1108_v6, %v1032_v17  ;;  %v323_v43 = vmul.f32 %v1108_v6, %v1026_v13  ;;  %v324_v55 = vmul.f32 %v1108_v6, %v1048_v31 }
 0x142   :  { %v325_v51 = vmul.f32 %v1108_v6, %v1042_v27  ;;  %v326_v3 = vmul.f32 %v1108_v6, %v1064_v48  ;;  %v327_v63 = vmul.f32 %v1108_v6, %v1058_v42  ;;  %v328_v18 = vmul.f32 %v1108_v6, %v1080_v1 }
 0x143   :  { %v1140_v17 = vadd.f32 %v1123_v19, %v330_v8  ;;  %v338_v13 = vadd.f32 %v1123_v19, %v316_v9  ;;  %v339_v20 = vadd.f32 %v1123_v19, %v317_v10  ;;  %v340_v31 = vadd.f32 %v1123_v19, %v318_v11 }
 0x144   :  { %v341_v27 = vadd.f32 %v1123_v19, %v319_v14  ;;  %v342_v21 = vadd.f32 %v1123_v19, %v320_v15  ;;  %v343_v48 = vadd.f32 %v1123_v19, %v321_v16  ;;  %v344_v42 = vadd.f32 %v1123_v19, %v322_v45 }
 0x145   :  { %v354_v22 = vmax.f32 %v338_v13, 0.0  ;;  %v355_v23 = vmax.f32 %v339_v20, 0.0  ;;  %v356_v1 = vmax.f32 %v340_v31, 0.0  ;;  %v368_v29 = vmax.f32 %v1140_v17, 0.0  ;;  %v452_v17 = vld [vmem:[%s1242_s5 + $0x10] sm:$0xff] }
 0x146   :  { %v357_v24 = vmax.f32 %v341_v27, 0.0  ;;  %v358_v25 = vmax.f32 %v342_v21, 0.0  ;;  %v359_v26 = vmax.f32 %v343_v48, 0.0  ;;  %v360_v28 = vmax.f32 %v344_v42, 0.0 }
 0x147   :  { %v387_v30 = vrot.slane %v354_v22, 1  ;;  %v388_v32 = vrot.slane %v355_v23, 1  ;;  %v390_v41 = vrot.slane %v356_v1, 1  ;;  %v345_v39 = vadd.f32 %v1123_v19, %v323_v43 }
 0x148   :  { %v392_v33 = vrot.slane %v357_v24, 1  ;;  %v394_v34 = vrot.slane %v358_v25, 1  ;;  %v396_v35 = vrot.slane %v359_v26, 1  ;;  %v398_v36 = vrot.slane %v360_v28, 1 }
 0x149   :  { %v389_v37 = vsel %vm386_vm3, %v387_v30, %v388_v32  ;;  %v391_v38 = vsel %vm386_vm3, %v388_v32, %v390_v41  ;;  %v346_v40 = vadd.f32 %v1123_v19, %v324_v55  ;;  %v361_v59 = vmax.f32 %v345_v39, 0.0 }
 0x14a   :  { %v434_v44 = vmax.f32 %v354_v22, %v389_v37  ;;  %v435_v46 = vmax.f32 %v355_v23, %v391_v38  ;;  %v393_v47 = vsel %vm386_vm3, %v390_v41, %v392_v33  ;;  %v395_v49 = vsel %vm386_vm3, %v392_v33, %v394_v34 }
 0x14b   :  { %v436_v50 = vmax.f32 %v356_v1, %v393_v47  ;;  %v437_v52 = vmax.f32 %v357_v24, %v395_v49  ;;  %v397_v53 = vsel %vm386_vm3, %v394_v34, %v396_v35  ;;  %v399_v54 = vsel %vm386_vm3, %v396_v35, %v398_v36  ;;  %v455_v47 = vld [vmem:[%s1242_s5 + $0x28] sm:$0xff]  ;;  %v456_v49 = vld [vmem:[%s1242_s5 + $0x30] sm:$0xff] }
 0x14c   :  { %v803_v56 = vpack.c.bf16 %v435_v46, %v434_v44  ;;  %v438_v57 = vmax.f32 %v358_v25, %v397_v53  ;;  %v439_v58 = vmax.f32 %v359_v26, %v399_v54  ;;  %v362_v62 = vmax.f32 %v346_v40, 0.0  ;;  %v451_v44 = vld [vmem:[%s1242_s5 + $0x8] sm:$0xff]  ;;  %v454_v46 = vld [vmem:[%s1242_s5 + $0x20] sm:$0xff] }
 0x14d   :  { %v807_v61 = vpack.c.bf16 %v437_v52, %v436_v50  ;;  %v347_v0 = vadd.f32 %v1123_v19, %v325_v51  ;;  %v348_v2 = vadd.f32 %v1123_v19, %v326_v3  ;;  %v400_v5 = vrot.slane %v361_v59, 1  ;;  %v457_v50 = vld [vmem:[%s1242_s5 + $0x38] sm:$0xf] }
 0x14e   :  { %804 = vmatprep.subr.bf16.mxu1 %v803_v56  ;;  %v811_v4 = vpack.c.bf16 %v439_v58, %v438_v57  ;;  %v349_v7 = vadd.f32 %v1123_v19, %v327_v63  ;;  %v350_v8 = vadd.f32 %v1123_v19, %v328_v18  ;;  %v402_v9 = vrot.slane %v362_v62, 1 }
 0x14f   :  { %806 = vmatpush3.bf16.msra.mxu1 %v803_v56  ;;  %v363_v10 = vmax.f32 %v347_v0, 0.0  ;;  %v364_v11 = vmax.f32 %v348_v2, 0.0  ;;  %v329_v14 = vmul.f32 %v1108_v6, %v1074_v60  ;;  %v401_v15 = vsel %vm386_vm3, %v398_v36, %v400_v5 }
 0x150   :  { %808 = vmatprep.subr.bf16.mxu1 %v807_v61  ;;  %v365_v16 = vmax.f32 %v349_v7, 0.0  ;;  %v366_v45 = vmax.f32 %v350_v8, 0.0  ;;  %v331_v43 = vmul.f32 %v1108_v6, %v1090_v12  ;;  %v403_v55 = vsel %vm386_vm3, %v400_v5, %v402_v9 }
 0x151   :  { %v440_v51 = vmax.f32 %v360_v28, %v401_v15  ;;  %v404_v3 = vrot.slane %v363_v10, 1  ;;  %v406_v63 = vrot.slane %v364_v11, 1  ;;  %v441_v18 = vmax.f32 %v361_v59, %v403_v55 }
 0x152   :  { %v408_v13 = vrot.slane %v365_v16, 1  ;;  %v410_v20 = vrot.slane %v366_v45, 1  ;;  %v351_v31 = vadd.f32 %v1123_v19, %v329_v14  ;;  %v414_v60 = vrot.slane %v368_v29, 1 }
 0x153   :  { %810 = vmatpush3.bf16.msra.mxu1 %v807_v61  ;;  %v405_v27 = vsel %vm386_vm3, %v402_v9, %v404_v3  ;;  %v407_v21 = vsel %vm386_vm3, %v404_v3, %v406_v63  ;;  %v353_v12 = vadd.f32 %v1123_v19, %v331_v43  ;;  %v815_v6 = vpack.c.bf16 %v441_v18, %v440_v51 }
 0x154   :  { %812 = vmatprep.subr.bf16.mxu1 %v811_v4  ;;  %v442_v48 = vmax.f32 %v362_v62, %v405_v27  ;;  %v443_v42 = vmax.f32 %v363_v10, %v407_v21  ;;  %v409_v22 = vsel %vm386_vm3, %v406_v63, %v408_v13  ;;  %v411_v23 = vsel %vm386_vm3, %v408_v13, %v410_v20 }
 0x155   :  { %v444_v1 = vmax.f32 %v364_v11, %v409_v22  ;;  %v367_v24 = vmax.f32 %v351_v31, 0.0  ;;  %v369_v25 = vmax.f32 %v353_v12, 0.0  ;;  %v445_v28 = vmax.f32 %v365_v16, %v411_v23 }
 0x156   :  { %v819_v26 = vpack.c.bf16 %v443_v42, %v442_v48 }
 0x157   :  { %814 = vmatpush3.bf16.msra.mxu1 %v811_v4  ;;  %v412_v30 = vrot.slane %v367_v24, 1  ;;  %v416_v32 = vrot.slane %v369_v25, 1  ;;  %v823_v41 = vpack.c.bf16 %v445_v28, %v444_v1 }
 0x158   :  { %816 = vmatprep.subr.bf16.mxu1 %v815_v6 }
 0x159   :  { %v413_v19 = vsel %vm386_vm3, %v410_v20, %v412_v30  ;;  %v415_v33 = vsel %vm386_vm3, %v412_v30, %v414_v60  ;;  %v417_v34 = vsel %vm386_vm3, %v414_v60, %v416_v32  ;;  %v449_v35 = vmax.f32 %v369_v25, %v416_v32 }
 0x15a   :  { %v446_v36 = vmax.f32 %v366_v45, %v413_v19  ;;  %v447_v37 = vmax.f32 %v367_v24, %v415_v33  ;;  %v448_v38 = vmax.f32 %v368_v29, %v417_v34  ;;  %v453_v29 = vld [vmem:[%s1242_s5 + $0x18] sm:$0xff] }
 0x15b   :  { %818 = vmatpush3.bf16.msra.mxu1 %v815_v6 }
 0x15c   :  { %820 = vmatprep.subr.bf16.mxu1 %v819_v26  ;;  %v827_v39 = vpack.c.bf16 %v447_v37, %v446_v36  ;;  %v831_v40 = vpack.c.bf16 %v449_v35, %v448_v38 }
 0x15f   :  { %822 = vmatpush3.bf16.msra.mxu1 %v819_v26 }
 0x160   :  { %824 = vmatprep.subr.bf16.mxu1 %v823_v41 }
 0x163   :  { %826 = vmatpush3.bf16.msra.mxu1 %v823_v41 }
 0x164   :  { %828 = vmatprep.subr.bf16.mxu1 %v827_v39 }
 0x167   :  { %830 = vmatpush3.bf16.msra.mxu1 %v827_v39 }
 0x168   :  { %833 = vmatprep.subr.msk.bf16.mxu1 %vm832_vm6, %v831_v40 }
 0x16b   :  { %836 = vmatpush3.bf16.msk.msra.mxu1 %vm832_vm6, %v831_v40 }
 0x16e   :  { %760 = vmatmul.mubr.msk.f32.vlgmr.msra.gmra.mrb[0].mxu1 %vm458_vm0, %v451_v44 }
 0x16f   :  { %762 = vmatprep.mubr.msk.f32.mxu1 %vm458_vm0, %v452_v17 }
 0x172   :  { %763 = vmatmul.mubr.msk.f32.gmra.mrb[2].mxu1 %vm458_vm0, %v453_v29 }
 0x173   :  { %765 = vmatprep.mubr.msk.f32.mxu1 %vm458_vm0, %v454_v46 }
 0x176   :  { %766 = vmatmul.mubr.msk.f32.gmra.mrb[4].mxu1 %vm458_vm0, %v455_v47 }
 0x177   :  { %768 = vmatprep.mubr.msk.f32.mxu1 %vm458_vm0, %v456_v49 }
 0x17a   :  { %769 = vmatmul.mubr.msk.f32.gmra.mrb[6].mxu1 %vm458_vm0, %v457_v50 }
 0x241   :  { %v761_v52 = vpop.f32.mrb[0].mxu1 }
 0x242   :  { %593 = vst.msk [vmem:[%s1246_s6 + $0x8] sm:$0xff] %vm207_vm1, %v761_v52  ;;  %v553_v53 = vpop.f32.mrb[1].mxu1 }
 0x243   :  { %592 = vst.msk [vmem:[%s1246_s6] sm:$0xff] %vm207_vm1, %v553_v53 }
 0x245   :  { %v764_v54 = vpop.f32.mrb[2].mxu1 }
 0x246   :  { %595 = vst.msk [vmem:[%s1246_s6 + $0x18] sm:$0xff] %vm207_vm1, %v764_v54  ;;  %v563_v56 = vpop.f32.mrb[3].mxu1 }
 0x247   :  { %594 = vst.msk [vmem:[%s1246_s6 + $0x10] sm:$0xff] %vm207_vm1, %v563_v56 }
 0x249   :  { %v767_v57 = vpop.f32.mrb[4].mxu1 }
 0x24a   :  { %597 = vst.msk [vmem:[%s1246_s6 + $0x28] sm:$0xff] %vm207_vm1, %v767_v57  ;;  %v573_v58 = vpop.f32.mrb[5].mxu1 }
 0x24b   :  { %596 = vst.msk [vmem:[%s1246_s6 + $0x20] sm:$0xff] %vm207_vm1, %v573_v58 }
 0x24d   :  { %v770_v59 = vpop.f32.mrb[6].mxu1 }
 0x24e   :  { %600 = vst.msk [vmem:[%s1246_s6 + $0x38] sm:$0xf] %vm599_vm7, %v770_v59  ;;  %v583_v61 = vpop.f32.mrb[7].mxu1 }
 0x24f   :  { %598 = vst.msk [vmem:[%s1246_s6 + $0x30] sm:$0xff] %vm207_vm1, %v583_v61 }

// kernel: wdcnn_forward.8
= control target key start
LH: loop header
LB: loop body
LE: loop exit
PB: predicated region body
PF: predicated region fallthrough
CT: control target
= control target key end

     0   :  { %vm42_vm0 = vcmask 523264   ;;  %vm227_vm1 = vcmask 252928   ;;  %v182_v61 = vlaneseq  ;;  %vm209_vm2 = vcmask 1046528   ;;  %s519_s1 = inlined_call_operand.vmem [shape: f32[64,64], index: 1, kind: input, shape index: {}]   ;;  %s520_s0 = inlined_call_operand.vmem [shape: f32[32,64], index: 0, kind: input, shape index: {}]   ;;  %s521_s5 = inlined_call_operand.vmem [shape: f32[16,31], index: 5, kind: input, shape index: {}]   ;;  %s522_s2 = inlined_call_operand.vmem [shape: f32[1,64], index: 2, kind: input, shape index: {}]   ;;  %s523_s3 = inlined_call_operand.vmem [shape: f32[1,64], index: 3, kind: input, shape index: {}]   ;;  %s524_s4 = inlined_call_operand.vmem [shape: f32[1,64], index: 4, kind: input, shape index: {}]   ;;  %s525_s6 = inlined_call_operand.vmem [shape: f32[16,64], index: 6, kind: output, shape index: {}]  }
   0x1   :  { %v27_v0 = vld [vmem:[%s519_s1] sm:$0xff]  ;;  %v28_v1 = vld [vmem:[%s519_s1 + $0x8] sm:$0xff]  ;;  %v29_v2 = vld [vmem:[%s519_s1 + $0x10] sm:$0xff]  ;;  %vm406_vm3 = vmmov 1  }
   0x2   :  { %v377_v3 = vpack.c.bf16 %v28_v1, %v27_v0  ;;  %v30_v4 = vld [vmem:[%s519_s1 + $0x18] sm:$0xff]  ;;  %v31_v6 = vld [vmem:[%s519_s1 + $0x20] sm:$0xff]  ;;  %v32_v7 = vld [vmem:[%s519_s1 + $0x28] sm:$0xff]  ;;  %v183_v62 = vshrl.u32 %v182_v61, 7 }
   0x3   :  { %v381_v5 = vpack.c.bf16 %v30_v4, %v29_v2  ;;  %v23_v8 = vld [vmem:[%s520_s0] sm:$0xff]  ;;  %v385_v9 = vpack.c.bf16 %v32_v7, %v31_v6  ;;  %v33_v10 = vld [vmem:[%s519_s1 + $0x30] sm:$0xff]  ;;  %v34_v11 = vld [vmem:[%s519_s1 + $0x38] sm:$0xff] }
   0x4   :  { %378 = vmatprep.subr.bf16.mxu0 %v377_v3  ;;  %360 = vmatprep.mubr.msk.f32.mxu0 %vm42_vm0, %v23_v8  ;;  %v389_v12 = vpack.c.bf16 %v34_v11, %v33_v10  ;;  %v24_v13 = vld [vmem:[%s520_s0 + $0x8] sm:$0xff]  ;;  %v25_v14 = vld [vmem:[%s520_s0 + $0x10] sm:$0xff]  ;;  %v26_v15 = vld [vmem:[%s520_s0 + $0x18] sm:$0xff]  ;;  %v184_v0 = vsub.s32 0, %v183_v62 }
   0x5   :  { %380 = vmatpush3.bf16.msra.mxu0 %v377_v3  ;;  %v225_v16 = vld [vmem:[%s521_s5] sm:$0xff]  ;;  %vm398_vm4 = vmpackc.low %vm209_vm2, %vm406_vm3 }
   0x6   :  { %382 = vmatprep.subr.bf16.mxu0 %v381_v5  ;;  %374 = vmatprep.mubr.msk.f32.mxu1 %vm227_vm1, %v225_v16  ;;  %v318_v17 = vld [vmem:[%s522_s2] ss:$0 sm:$0xff] }
   0x7   :  { %v174_v63 = vld [vmem:[%s523_s3] sm:$0x1] }
   0x8   :  { %v178_v3 = vld [vmem:[%s524_s4] sm:$0x1] }
   0x9   :  { %384 = vmatpush3.bf16.msra.mxu0 %v381_v5 }
   0xa   :  { %386 = vmatprep.subr.bf16.mxu0 %v385_v9 }
   0xd   :  { %388 = vmatpush3.bf16.msra.mxu0 %v385_v9 }
   0xe   :  { %390 = vmatprep.subr.bf16.mxu0 %v389_v12 }
  0x11   :  { %392 = vmatpush3.bf16.msra.mxu0 %v389_v12 }
  0x14   :  { %361 = vmatmul.mubr.msk.f32.vlgmr.msra.gmra.mrb[0].mxu0 %vm42_vm0, %v24_v13 }
  0x15   :  { %363 = vmatprep.mubr.msk.f32.mxu0 %vm42_vm0, %v25_v14 }
  0x18   :  { %364 = vmatmul.mubr.msk.f32.gmra.mrb[2].mxu0 %vm42_vm0, %v26_v15 }
  0xe7   :  { %v362_v18 = vpop.f32.mrb[0].mxu0 }
  0xe8   :  { %v127_v19 = vadd.f32 %v362_v18, %v318_v17  ;;  %v121_v20 = vpop.f32.mrb[1].mxu0 }
  0xe9   :  { %v122_v21 = vadd.f32 %v318_v17, %v121_v20 }
  0xea   :  { %v141_v22 = vsel %vm42_vm0, %v127_v19, 0.0  ;;  %v155_v23 = vmul.f32 %v127_v19, %v127_v19 }
  0xeb   :  { %v140_v24 = vsel %vm42_vm0, %v122_v21, 0.0  ;;  %v154_v25 = vmul.f32 %v122_v21, %v122_v21  ;;  %v365_v26 = vpop.f32.mrb[2].mxu0 }
  0xec   :  { %v159_v27 = vsel %vm42_vm0, %v155_v23, 0.0  ;;  %v142_v28 = vadd.f32 %v141_v22, %v140_v24  ;;  %v137_v29 = vadd.f32 %v365_v26, %v318_v17  ;;  %v131_v30 = vpop.f32.mrb[3].mxu0 }
  0xed   :  { %v158_v31 = vsel %vm42_vm0, %v154_v25, 0.0  ;;  %v132_v32 = vadd.f32 %v318_v17, %v131_v30 }
  0xee   :  { %v160_v33 = vadd.f32 %v159_v27, %v158_v31  ;;  %v157_v34 = vmul.f32 %v137_v29, %v137_v29  ;;  %v145_v38 = vsel %vm42_vm0, %v137_v29, 0.0 }
  0xef   :  { %v143_v35 = vsel %vm42_vm0, %v132_v32, 0.0  ;;  %v156_v36 = vmul.f32 %v132_v32, %v132_v32 }
  0xf0   :  { %v144_v37 = vadd.f32 %v143_v35, %v142_v28  ;;  %v163_v42 = vsel %vm42_vm0, %v157_v34, 0.0 }
  0xf1   :  { %v161_v39 = vsel %vm42_vm0, %v156_v36, 0.0 }
  0xf2   :  { %v146_v40 = vadd.f32 %v145_v38, %v144_v37  ;;  %v162_v41 = vadd.f32 %v161_v39, %v160_v33  ;;  %v226_v33 = vld [vmem:[%s521_s5 + $0x8] sm:$0xff] }
  0xf4   :  { %v147_v43 = vrot.slane %v146_v40, 4  ;;  %v164_v44 = vadd.f32 %v163_v42, %v162_v41 }
  0xf6   :  { %v148_v45 = vadd.f32 %v147_v43, %v146_v40  ;;  %v165_v46 = vrot.slane %v164_v44, 4 }
  0xf8   :  { %v149_v47 = vrot.slane %v148_v45, 2  ;;  %v166_v48 = vadd.f32 %v165_v46, %v164_v44 }
  0xfa   :  { %v150_v49 = vadd.f32 %v149_v47, %v148_v45  ;;  %v167_v50 = vrot.slane %v166_v48, 2 }
  0xfc   :  { %v151_v51 = vrot.slane %v150_v49, 1  ;;  %v168_v52 = vadd.f32 %v167_v50, %v166_v48 }
  0xfe   :  { %v152_v53 = vadd.f32 %v151_v51, %v150_v49  ;;  %v169_v54 = vrot.slane %v168_v52, 1 }
 0x100   :  { %v153_v55 = vmul.f32 0.03125, %v152_v53  ;;  %v170_v56 = vadd.f32 %v169_v54, %v168_v52 }
 0x102   :  { %v171_v57 = vmul.f32 0.03125, %v170_v56  ;;  %v172_v58 = vmul.f32 %v153_v55, %v153_v55 }
 0x104   :  { %v173_v59 = vsub.f32 %v171_v57, %v172_v58 }
 0x106   :  { %v175_v60 = vadd.f32 1e-05, %v173_v59 }
 0x108   :  { %404 = vrsqrt.f32 %v175_v60 }
 0x112   :  { %v405_v1 = vpop.eup %404 }
 0x113   :  { %v177_v2 = vmul.f32 %v405_v1, %v174_v63 }
 0x115   :  { %v179_v4 = vmul.f32 %v177_v2, %v153_v55  ;;  %v185_v5 = vrot.slane %v177_v2, %v184_v0 }
 0x117   :  { %v180_v6 = vsub.f32 %v178_v3, %v179_v4  ;;  %v189_v7 = vmul.f32 %v185_v5, %v132_v32  ;;  %v187_v8 = vmul.f32 %v185_v5, %v122_v21  ;;  %v188_v9 = vmul.f32 %v185_v5, %v127_v19 }
 0x118   :  { %v190_v10 = vmul.f32 %v185_v5, %v137_v29 }
 0x119   :  { %v195_v11 = vrot.slane %v180_v6, %v184_v0 }
 0x11b   :  { %v199_v12 = vadd.f32 %v195_v11, %v189_v7  ;;  %v197_v13 = vadd.f32 %v195_v11, %v187_v8  ;;  %v198_v14 = vadd.f32 %v195_v11, %v188_v9  ;;  %v200_v15 = vadd.f32 %v195_v11, %v190_v10 }
 0x11d   :  { %v203_v16 = vmax.f32 %v199_v12, 0.0  ;;  %v201_v17 = vmax.f32 %v197_v13, 0.0  ;;  %v202_v18 = vmax.f32 %v198_v14, 0.0  ;;  %v204_v20 = vmax.f32 %v200_v15, 0.0 }
 0x11f   :  { %v210_v22 = vrot.slane %v201_v17, 1  ;;  %v211_v23 = vrot.slane %v202_v18, 1  ;;  %v213_v24 = vrot.slane %v203_v16, 1  ;;  %v215_v25 = vrot.slane %v204_v20, 1 }
 0x121   :  { %v212_v26 = vsel %vm209_vm2, %v210_v22, %v211_v23  ;;  %v214_v21 = vsel %vm209_vm2, %v211_v23, %v213_v24  ;;  %v216_v19 = vsel %vm209_vm2, %v213_v24, %v215_v25  ;;  %v224_v27 = vmax.f32 %v204_v20, %v215_v25 }
 0x122   :  { %v221_v28 = vmax.f32 %v201_v17, %v212_v26  ;;  %v222_v29 = vmax.f32 %v202_v18, %v214_v21  ;;  %v223_v30 = vmax.f32 %v203_v16, %v216_v19 }
 0x124   :  { %v393_v31 = vpack.c.bf16 %v222_v29, %v221_v28  ;;  %v397_v32 = vpack.c.bf16 %v224_v27, %v223_v30 }
 0x126   :  { %394 = vmatprep.subr.bf16.mxu1 %v393_v31 }
 0x127   :  { %396 = vmatpush3.bf16.msra.mxu1 %v393_v31 }
 0x128   :  { %399 = vmatprep.subr.msk.bf16.mxu1 %vm398_vm4, %v397_v32 }
 0x12b   :  { %402 = vmatpush3.bf16.msk.msra.mxu1 %vm398_vm4, %v397_v32 }
 0x12e   :  { %375 = vmatmul.mubr.msk.f32.vlgmr.msra.gmra.mrb[0].mxu1 %vm227_vm1, %v226_v33 }
 0x201   :  { %v376_v34 = vpop.f32.mrb[0].mxu1 }
 0x202   :  { %313 = vst.msk [vmem:[%s525_s6 + $0x8] sm:$0xff] %vm42_vm0, %v376_v34  ;;  %v303_v35 = vpop.f32.mrb[1].mxu1 }
 0x203   :  { %312 = vst.msk [vmem:[%s525_s6] sm:$0xff] %vm42_vm0, %v303_v35 }

// kernel: wdcnn_forward.9
= control target key start
LH: loop header
LB: loop body
LE: loop exit
PB: predicated region body
PF: predicated region fallthrough
CT: control target
= control target key end

     0   :  { %v343_v0 = vmov 0.0|0.0   ;;  %vm58_vm0 = vcmask 523264   ;;  %vm344_vm1 = vmmov 0   ;;  %v345_v41 = vmov 0.0   ;;  %s501_s1 = inlined_call_operand.vmem [shape: f32[192,64], index: 1, kind: input, shape index: {}]   ;;  %s502_s0 = inlined_call_operand.vmem [shape: f32[16,192], index: 0, kind: input, shape index: {}]   ;;  %s503_s2 = inlined_call_operand.vmem [shape: f32[1,64], index: 2, kind: input, shape index: {}]   ;;  %s504_s3 = inlined_call_operand.vmem [shape: f32[1,64], index: 3, kind: input, shape index: {}]   ;;  %s505_s4 = inlined_call_operand.vmem [shape: f32[1,64], index: 4, kind: input, shape index: {}]   ;;  %s506_s5 = inlined_call_operand.vmem [shape: f32[8,15], index: 5, kind: input, shape index: {}]   ;;  %s507_s6 = inlined_call_operand.vmem [shape: f32[8,64], index: 6, kind: output, shape index: {}]  }
   0x1   :  { %297 = vmatprep.subr.bf16.mxu0 %v343_v0  ;;  %v27_v1 = vld [vmem:[%s501_s1] sm:$0xff]  ;;  %v28_v2 = vld [vmem:[%s501_s1 + $0x8] sm:$0xff]  ;;  %v29_v3 = vld [vmem:[%s501_s1 + $0x10] sm:$0xff]  ;;  %333 = vmatprep.subr.bf16.mxu1 %v343_v0  ;;  %vm191_vm2 = vcmask 1046528   ;;  %vm346_vm3 = vmmov 1   ;;  %vm200_vm5 = vcmask 121856  }
   0x2   :  { %v298_v4 = vpack.c.bf16 %v28_v2, %v27_v1  ;;  %v30_v5 = vld [vmem:[%s501_s1 + $0x18] sm:$0xff]  ;;  %v31_v7 = vld [vmem:[%s501_s1 + $0x20] sm:$0xff]  ;;  %v32_v8 = vld [vmem:[%s501_s1 + $0x28] sm:$0xff]  ;;  %294 = vmatprep.mubr.msk.f32.mxu1 %vm344_vm1, %v345_v41 }
   0x3   :  { %v301_v6 = vpack.c.bf16 %v30_v5, %v29_v3  ;;  %v304_v9 = vpack.c.bf16 %v32_v8, %v31_v7  ;;  %v33_v10 = vld [vmem:[%s501_s1 + $0x30] sm:$0xff]  ;;  %v34_v11 = vld [vmem:[%s501_s1 + $0x38] sm:$0xff]  ;;  %v24_v12 = vld [vmem:[%s502_s0 + $0x8] sm:$0xff] }
   0x4   :  { %299 = vmatpush1.bf16.msra.mxu0 %v298_v4  ;;  %283 = vmatprep.mubr.msk.f32.mxu0 %vm58_vm0, %v24_v12  ;;  %v307_v13 = vpack.c.bf16 %v34_v11, %v33_v10  ;;  %v35_v14 = vld [vmem:[%s501_s1 + $0x40] sm:$0xff]  ;;  %v36_v15 = vld [vmem:[%s501_s1 + $0x48] sm:$0xff]  ;;  %v37_v17 = vld [vmem:[%s501_s1 + $0x50] sm:$0xff]  ;;  %v172_v10 = vlaneseq }
   0x5   :  { %300 = vmatprep.subr.bf16.mxu0 %v343_v0  ;;  %v310_v16 = vpack.c.bf16 %v36_v15, %v35_v14  ;;  %v38_v18 = vld [vmem:[%s501_s1 + $0x58] sm:$0xff]  ;;  %v39_v20 = vld [vmem:[%s501_s1 + $0x60] sm:$0xff]  ;;  %v40_v21 = vld [vmem:[%s501_s1 + $0x68] sm:$0xff] }
   0x6   :  { %v313_v19 = vpack.c.bf16 %v38_v18, %v37_v17  ;;  %v316_v22 = vpack.c.bf16 %v40_v21, %v39_v20  ;;  %v41_v23 = vld [vmem:[%s501_s1 + $0x70] sm:$0xff]  ;;  %v42_v24 = vld [vmem:[%s501_s1 + $0x78] sm:$0xff]  ;;  %v43_v26 = vld [vmem:[%s501_s1 + $0x80] sm:$0xff]  ;;  %v173_v11 = vshrl.u32 %v172_v10, 7 }
   0x7   :  { %v319_v25 = vpack.c.bf16 %v42_v24, %v41_v23  ;;  %v44_v27 = vld [vmem:[%s501_s1 + $0x88] sm:$0xff]  ;;  %v45_v29 = vld [vmem:[%s501_s1 + $0x90] sm:$0xff]  ;;  %v46_v30 = vld [vmem:[%s501_s1 + $0x98] sm:$0xff] }
   0x8   :  { %302 = vmatpush1.bf16.msra.mxu0 %v301_v6  ;;  %v322_v28 = vpack.c.bf16 %v44_v27, %v43_v26  ;;  %v325_v31 = vpack.c.bf16 %v46_v30, %v45_v29  ;;  %v47_v32 = vld [vmem:[%s501_s1 + $0xa0] sm:$0xff]  ;;  %v48_v33 = vld [vmem:[%s501_s1 + $0xa8] sm:$0xff]  ;;  %v49_v35 = vld [vmem:[%s501_s1 + $0xb0] sm:$0xff] }
   0x9   :  { %303 = vmatprep.subr.bf16.mxu0 %v343_v0  ;;  %v328_v34 = vpack.c.bf16 %v48_v33, %v47_v32  ;;  %v50_v36 = vld [vmem:[%s501_s1 + $0xb8] sm:$0xff]  ;;  %v23_v38 = vld [vmem:[%s502_s0] sm:$0xff]  ;;  %v25_v40 = vld [vmem:[%s502_s0 + $0x10] sm:$0xff] }
   0xa   :  { %v331_v37 = vpack.c.bf16 %v50_v36, %v49_v35  ;;  %v26_v39 = vld [vmem:[%s502_s0 + $0x18] sm:$0xff]  ;;  %v282_v42 = vld [vmem:[%s503_s2] ss:$0 sm:$0xff]  ;;  %vm335_vm4 = vmpackc.low %vm191_vm2, %vm346_vm3 }
   0xb   :  { %v164_v12 = vld [vmem:[%s504_s3] sm:$0x1] }
   0xc   :  { %305 = vmatpush1.bf16.msra.mxu0 %v304_v9  ;;  %v199_v33 = vld [vmem:[%s506_s5] sm:$0xff] }
   0xd   :  { %306 = vmatprep.subr.bf16.mxu0 %v343_v0 }
  0x10   :  { %308 = vmatpush1.bf16.msra.mxu0 %v307_v13  ;;  %v174_v13 = vsub.s32 0, %v173_v11 }
  0x11   :  { %309 = vmatprep.subr.bf16.mxu0 %v343_v0 }
  0x14   :  { %311 = vmatpush1.bf16.msra.mxu0 %v310_v16  ;;  %v168_v16 = vld [vmem:[%s505_s4] sm:$0x1] }
  0x15   :  { %312 = vmatprep.subr.bf16.mxu0 %v343_v0 }
  0x18   :  { %314 = vmatpush1.bf16.msra.mxu0 %v313_v19 }
  0x19   :  { %315 = vmatprep.subr.bf16.mxu0 %v343_v0 }
  0x1c   :  { %317 = vmatpush1.bf16.msra.mxu0 %v316_v22 }
  0x1d   :  { %318 = vmatprep.subr.bf16.mxu0 %v343_v0 }
  0x20   :  { %320 = vmatpush1.bf16.msra.mxu0 %v319_v25 }
  0x21   :  { %321 = vmatprep.subr.bf16.mxu0 %v343_v0 }
  0x24   :  { %323 = vmatpush1.bf16.msra.mxu0 %v322_v28 }
  0x25   :  { %324 = vmatprep.subr.bf16.mxu0 %v343_v0 }
  0x28   :  { %326 = vmatpush1.bf16.msra.mxu0 %v325_v31 }
  0x29   :  { %327 = vmatprep.subr.bf16.mxu0 %v343_v0 }
  0x2c   :  { %329 = vmatpush1.bf16.msra.mxu0 %v328_v34 }
  0x2d   :  { %330 = vmatprep.subr.bf16.mxu0 %v343_v0 }
  0x30   :  { %332 = vmatpush1.bf16.msra.mxu0 %v331_v37 }
  0x33   :  { %130 = vmatmul.mubr.f32.vlgmr.msra.gmra.mrb[0].mxu0 %v23_v38 }
  0x34   :  { %284 = vmatprep.mubr.msk.f32.mxu0 %vm58_vm0, %v26_v39 }
  0x37   :  { %135 = vmatmul.mubr.f32.gmra.mrb[2].mxu0 %v25_v40 }
 0x106   :  { %v131_v43 = vpop.f32.mrb[0].mxu0 }
 0x107   :  { %v132_v44 = vadd.f32 %v282_v42, %v131_v43  ;;  %v133_v45 = vpop.f32.mrb[1].mxu0 }
 0x109   :  { %v150_v47 = vmul.f32 %v132_v44, %v132_v44  ;;  %v140_v50 = vsel %vm58_vm0, %v132_v44, 0.0 }
 0x10a   :  { %v136_v46 = vpop.f32.mrb[2].mxu0 }
 0x10b   :  { %v137_v48 = vadd.f32 %v282_v42, %v136_v46  ;;  %v138_v49 = vpop.f32.mrb[3].mxu0  ;;  %v152_v54 = vsel %vm58_vm0, %v150_v47, 0.0 }
 0x10d   :  { %v141_v51 = vsel %vm58_vm0, %v137_v48, 0.0  ;;  %v151_v52 = vmul.f32 %v137_v48, %v137_v48 }
 0x10e   :  { %v142_v53 = vadd.f32 %v141_v51, %v140_v50 }
 0x10f   :  { %v153_v55 = vsel %vm58_vm0, %v151_v52, 0.0 }
 0x110   :  { %v143_v56 = vrot.slane %v142_v53, 4  ;;  %v154_v57 = vadd.f32 %v153_v55, %v152_v54 }
 0x112   :  { %v144_v58 = vadd.f32 %v143_v56, %v142_v53  ;;  %v155_v59 = vrot.slane %v154_v57, 4 }
 0x114   :  { %v145_v60 = vrot.slane %v144_v58, 2  ;;  %v156_v61 = vadd.f32 %v155_v59, %v154_v57 }
 0x116   :  { %v146_v62 = vadd.f32 %v145_v60, %v144_v58  ;;  %v157_v63 = vrot.slane %v156_v61, 2 }
 0x118   :  { %v147_v0 = vrot.slane %v146_v62, 1  ;;  %v158_v1 = vadd.f32 %v157_v63, %v156_v61 }
 0x11a   :  { %v148_v2 = vadd.f32 %v147_v0, %v146_v62  ;;  %v159_v3 = vrot.slane %v158_v1, 1 }
 0x11c   :  { %v149_v4 = vmul.f32 0.0625, %v148_v2  ;;  %v160_v5 = vadd.f32 %v159_v3, %v158_v1 }
 0x11e   :  { %v161_v6 = vmul.f32 0.0625, %v160_v5  ;;  %v162_v7 = vmul.f32 %v149_v4, %v149_v4 }
 0x120   :  { %v163_v8 = vsub.f32 %v161_v6, %v162_v7 }
 0x122   :  { %v165_v9 = vadd.f32 1e-05, %v163_v8 }
 0x124   :  { %341 = vrsqrt.f32 %v165_v9 }
 0x12e   :  { %v342_v14 = vpop.eup %341 }
 0x12f   :  { %v167_v15 = vmul.f32 %v342_v14, %v164_v12 }
 0x131   :  { %v169_v17 = vmul.f32 %v167_v15, %v149_v4  ;;  %v175_v18 = vrot.slane %v167_v15, %v174_v13 }
 0x133   :  { %v170_v19 = vsub.f32 %v168_v16, %v169_v17  ;;  %v177_v20 = vmul.f32 %v175_v18, %v132_v44  ;;  %v178_v21 = vmul.f32 %v175_v18, %v137_v48 }
 0x135   :  { %v183_v22 = vrot.slane %v170_v19, %v174_v13 }
 0x137   :  { %v186_v23 = vadd.f32 %v183_v22, %v178_v21  ;;  %v185_v24 = vadd.f32 %v183_v22, %v177_v20 }
 0x139   :  { %v188_v25 = vmax.f32 %v186_v23, 0.0  ;;  %v187_v26 = vmax.f32 %v185_v24, 0.0 }
 0x13b   :  { %v192_v27 = vrot.slane %v187_v26, 1  ;;  %v193_v28 = vrot.slane %v188_v25, 1 }
 0x13d   :  { %v194_v29 = vsel %vm191_vm2, %v192_v27, %v193_v28  ;;  %v198_v30 = vmax.f32 %v188_v25, %v193_v28 }
 0x13e   :  { %v197_v31 = vmax.f32 %v187_v26, %v194_v29 }
 0x140   :  { %v334_v32 = vpack.c.bf16 %v198_v30, %v197_v31 }
 0x142   :  { %336 = vmatpush3.bf16.msk.msra.mxu1 %vm335_vm4, %v334_v32 }
 0x145   :  { %295 = vmatmul.mubr.msk.f32.vlgmr.msra.gmra.mrb[0].mxu1 %vm200_vm5, %v199_v33 }
 0x218   :  { %v273_v34 = vpop.f32.mrb[0].mxu1 }
 0x219   :  { %277 = vst.msk [vmem:[%s507_s6] sm:$0xff] %vm58_vm0, %v273_v34  ;;  %v296_v35 = vpop.f32.mrb[1].mxu1 }

// kernel: wdcnn_forward.10
= control target key start
LH: loop header
LB: loop body
LE: loop exit
PB: predicated region body
PF: predicated region fallthrough
CT: control target
= control target key end

     0   :  { %v314_v0 = vmov 0.0|0.0   ;;  %vm57_vm0 = vcmask 523264   ;;  %v315_v39 = vmov 0.0   ;;  %vm316_vm1 = vmmov 0   ;;  %s454_s1 = inlined_call_operand.vmem [shape: f32[192,64], index: 1, kind: input, shape index: {}]   ;;  %s455_s0 = inlined_call_operand.vmem [shape: f32[4,192], index: 0, kind: input, shape index: {}]   ;;  %s456_s2 = inlined_call_operand.vmem [shape: f32[1,64], index: 2, kind: input, shape index: {}]   ;;  %s457_s3 = inlined_call_operand.vmem [shape: f32[1,64], index: 3, kind: input, shape index: {}]   ;;  %s458_s4 = inlined_call_operand.vmem [shape: f32[1,64], index: 4, kind: input, shape index: {}]   ;;  %s459_s5 = inlined_call_operand.vmem [shape: f32[2,3], index: 5, kind: input, shape index: {}]   ;;  %s460_s6 = inlined_call_operand.vmem [shape: f32[2,64], index: 6, kind: output, shape index: {}]  }
   0x1   :  { %272 = vmatprep.subr.bf16.mxu0 %v314_v0  ;;  %v24_v1 = vld [vmem:[%s454_s1] sm:$0xff]  ;;  %v25_v2 = vld [vmem:[%s454_s1 + $0x8] sm:$0xff]  ;;  %v26_v3 = vld [vmem:[%s454_s1 + $0x10] sm:$0xff]  ;;  %267 = vmatprep.subr.mxu1 %v315_v39  ;;  %vm130_vm2 = vcmask 519168   ;;  %vm181_vm3 = vcmask 1042432   ;;  %vm177_vm4 = vcmask 23552  }
   0x2   :  { %v273_v4 = vpack.c.bf16 %v25_v2, %v24_v1  ;;  %v27_v5 = vld [vmem:[%s454_s1 + $0x18] sm:$0xff]  ;;  %v28_v7 = vld [vmem:[%s454_s1 + $0x20] sm:$0xff]  ;;  %v29_v8 = vld [vmem:[%s454_s1 + $0x28] sm:$0xff]  ;;  %269 = vmatprep.mubr.msk.f32.mxu1 %vm316_vm1, %v315_v39  ;;  %vm255_vm5 = vcmask 517120  }
   0x3   :  { %v276_v6 = vpack.c.bf16 %v27_v5, %v26_v3  ;;  %v279_v9 = vpack.c.bf16 %v29_v8, %v28_v7  ;;  %v30_v10 = vld [vmem:[%s454_s1 + $0x30] sm:$0xff]  ;;  %v31_v11 = vld [vmem:[%s454_s1 + $0x38] sm:$0xff]  ;;  %v23_v12 = vld [vmem:[%s455_s0] sm:$0xff] }
   0x4   :  { %274 = vmatpush1.bf16.msra.mxu0 %v273_v4  ;;  %v56_v13 = vcombine.high %v23_v12, %v23_v12  ;;  %v282_v14 = vpack.c.bf16 %v31_v11, %v30_v10  ;;  %v32_v15 = vld [vmem:[%s454_s1 + $0x40] sm:$0xff]  ;;  %v33_v16 = vld [vmem:[%s454_s1 + $0x48] sm:$0xff]  ;;  %v34_v18 = vld [vmem:[%s454_s1 + $0x50] sm:$0xff] }
   0x5   :  { %275 = vmatprep.subr.bf16.mxu0 %v314_v0  ;;  %v285_v17 = vpack.c.bf16 %v33_v16, %v32_v15  ;;  %v35_v19 = vld [vmem:[%s454_s1 + $0x58] sm:$0xff]  ;;  %v36_v21 = vld [vmem:[%s454_s1 + $0x60] sm:$0xff]  ;;  %v37_v22 = vld [vmem:[%s454_s1 + $0x68] sm:$0xff] }
   0x6   :  { %262 = vmatprep.mubr.msk.f32.mxu0 %vm57_vm0, %v56_v13  ;;  %v288_v20 = vpack.c.bf16 %v35_v19, %v34_v18  ;;  %v291_v23 = vpack.c.bf16 %v37_v22, %v36_v21  ;;  %v38_v24 = vld [vmem:[%s454_s1 + $0x70] sm:$0xff]  ;;  %v39_v25 = vld [vmem:[%s454_s1 + $0x78] sm:$0xff]  ;;  %v40_v27 = vld [vmem:[%s454_s1 + $0x80] sm:$0xff] }
   0x7   :  { %v294_v26 = vpack.c.bf16 %v39_v25, %v38_v24  ;;  %v41_v28 = vld [vmem:[%s454_s1 + $0x88] sm:$0xff]  ;;  %v42_v30 = vld [vmem:[%s454_s1 + $0x90] sm:$0xff]  ;;  %v43_v31 = vld [vmem:[%s454_s1 + $0x98] sm:$0xff] }
   0x8   :  { %277 = vmatpush1.bf16.msra.mxu0 %v276_v6  ;;  %v297_v29 = vpack.c.bf16 %v41_v28, %v40_v27  ;;  %v300_v32 = vpack.c.bf16 %v43_v31, %v42_v30  ;;  %v44_v33 = vld [vmem:[%s454_s1 + $0xa0] sm:$0xff]  ;;  %v45_v34 = vld [vmem:[%s454_s1 + $0xa8] sm:$0xff]  ;;  %v46_v36 = vld [vmem:[%s454_s1 + $0xb0] sm:$0xff] }
   0x9   :  { %278 = vmatprep.subr.bf16.mxu0 %v314_v0  ;;  %v303_v35 = vpack.c.bf16 %v45_v34, %v44_v33  ;;  %v47_v37 = vld [vmem:[%s454_s1 + $0xb8] sm:$0xff]  ;;  %v261_v40 = vld [vmem:[%s456_s2] ss:$0 sm:$0xff] }
   0xa   :  { %v306_v38 = vpack.c.bf16 %v47_v37, %v46_v36  ;;  %v150_v2 = vld [vmem:[%s457_s3] sm:$0x1] }
   0xb   :  { %v154_v6 = vld [vmem:[%s458_s4] sm:$0x1] }
   0xc   :  { %280 = vmatpush1.bf16.msra.mxu0 %v279_v9  ;;  %v176_v16 = vld [vmem:[%s459_s5] sm:$0x3] }
   0xd   :  { %281 = vmatprep.subr.bf16.mxu0 %v314_v0 }
  0x10   :  { %283 = vmatpush1.bf16.msra.mxu0 %v282_v14 }
  0x11   :  { %284 = vmatprep.subr.bf16.mxu0 %v314_v0 }
  0x14   :  { %286 = vmatpush1.bf16.msra.mxu0 %v285_v17 }
  0x15   :  { %287 = vmatprep.subr.bf16.mxu0 %v314_v0 }
  0x18   :  { %289 = vmatpush1.bf16.msra.mxu0 %v288_v20 }
  0x19   :  { %290 = vmatprep.subr.bf16.mxu0 %v314_v0 }
  0x1c   :  { %292 = vmatpush1.bf16.msra.mxu0 %v291_v23 }
  0x1d   :  { %293 = vmatprep.subr.bf16.mxu0 %v314_v0 }
  0x20   :  { %295 = vmatpush1.bf16.msra.mxu0 %v294_v26 }
  0x21   :  { %296 = vmatprep.subr.bf16.mxu0 %v314_v0 }
  0x24   :  { %298 = vmatpush1.bf16.msra.mxu0 %v297_v29 }
  0x25   :  { %299 = vmatprep.subr.bf16.mxu0 %v314_v0 }
  0x28   :  { %301 = vmatpush1.bf16.msra.mxu0 %v300_v32 }
  0x29   :  { %302 = vmatprep.subr.bf16.mxu0 %v314_v0 }
  0x2c   :  { %304 = vmatpush1.bf16.msra.mxu0 %v303_v35 }
  0x2d   :  { %305 = vmatprep.subr.bf16.mxu0 %v314_v0  ;;  %v158_v0 = vlaneseq }
  0x2f   :  { %v159_v1 = vshrl.u32 %v158_v0, 7 }
  0x30   :  { %307 = vmatpush1.bf16.msra.mxu0 %v306_v38 }
  0x31   :  { %v160_v3 = vsub.s32 0, %v159_v1 }
  0x33   :  { %125 = vmatmul.mubr.f32.vlgmr.msra.gmra.mrb[0].mxu0 %v23_v12 }
 0x106   :  { %v126_v41 = vpop.f32.mrb[0].mxu0 }
 0x107   :  { %v127_v42 = vadd.f32 %v261_v40, %v126_v41  ;;  %v128_v43 = vpop.f32.mrb[1].mxu0 }
 0x109   :  { %v131_v44 = vsel %vm130_vm2, %v127_v42, 0.0  ;;  %v139_v45 = vmul.f32 %v127_v42, %v127_v42 }
 0x10a   :  { %v132_v46 = vrot.slane %v131_v44, 4 }
 0x10b   :  { %v140_v47 = vsel %vm130_vm2, %v139_v45, 0.0 }
 0x10c   :  { %v133_v48 = vadd.f32 %v132_v46, %v131_v44  ;;  %v141_v49 = vrot.slane %v140_v47, 4 }
 0x10e   :  { %v134_v50 = vrot.slane %v133_v48, 2  ;;  %v142_v51 = vadd.f32 %v141_v49, %v140_v47 }
 0x110   :  { %v135_v52 = vadd.f32 %v134_v50, %v133_v48  ;;  %v143_v53 = vrot.slane %v142_v51, 2 }
 0x112   :  { %v136_v54 = vrot.slane %v135_v52, 1  ;;  %v144_v55 = vadd.f32 %v143_v53, %v142_v51 }
 0x114   :  { %v137_v56 = vadd.f32 %v136_v54, %v135_v52  ;;  %v145_v57 = vrot.slane %v144_v55, 1 }
 0x116   :  { %v138_v58 = vmul.f32 0.25, %v137_v56  ;;  %v146_v59 = vadd.f32 %v145_v57, %v144_v55 }
 0x118   :  { %v147_v60 = vmul.f32 0.25, %v146_v59  ;;  %v148_v61 = vmul.f32 %v138_v58, %v138_v58 }
 0x11a   :  { %v149_v62 = vsub.f32 %v147_v60, %v148_v61 }
 0x11c   :  { %v151_v63 = vadd.f32 1e-05, %v149_v62 }
 0x11e   :  { %312 = vrsqrt.f32 %v151_v63 }
 0x128   :  { %v313_v4 = vpop.eup %312 }
 0x129   :  { %v153_v5 = vmul.f32 %v313_v4, %v150_v2 }
 0x12b   :  { %v155_v7 = vmul.f32 %v153_v5, %v138_v58  ;;  %v161_v8 = vrot.slane %v153_v5, %v160_v3 }
 0x12d   :  { %v156_v9 = vsub.f32 %v154_v6, %v155_v7  ;;  %v163_v10 = vmul.f32 %v161_v8, %v127_v42 }
 0x12f   :  { %v168_v11 = vrot.slane %v156_v9, %v160_v3 }
 0x131   :  { %v170_v12 = vadd.f32 %v168_v11, %v163_v10 }
 0x133   :  { %v171_v13 = vmax.f32 %v170_v12, 0.0 }
 0x135   :  { %v173_v14 = vrot.slane %v171_v13, 1 }
 0x137   :  { %v175_v15 = vmax.f32 %v171_v13, %v173_v14 }
 0x139   :  { %268 = vmatpush3.msk.msra.mxu1 %vm181_vm3, %v175_v15 }
 0x13a   :  { %270 = vmatmul.mubr.msk.f32.vlgmr.msra.gmra.mrb[0].mxu1 %vm177_vm4, %v176_v16 }
 0x20d   :  { %v251_v17 = vpop.f32.mrb[0].mxu1 }
 0x20e   :  { %256 = vst.msk [vmem:[%s460_s6] sm:$0x3] %vm255_vm5, %v251_v17  ;;  %v271_v18 = vpop.f32.mrb[1].mxu1 }

// kernel: wdcnn_forward.11
= control target key start
LH: loop header
LB: loop body
LE: loop exit
PB: predicated region body
PF: predicated region fallthrough
CT: control target
= control target key end

     0   :  { %v543_v3 = vmov 0.0|0.0   ;;  %vm544_vm0 = vmmov 0   ;;  %v545_v6 = vmov 0.0   ;;  %s742_s0 = inlined_call_operand.vmem [shape: f32[2,64], index: 0, kind: input, shape index: {}]   ;;  %s743_s1 = inlined_call_operand.vmem [shape: f32[64,100], index: 1, kind: input, shape index: {}]   ;;  %s744_s2 = inlined_call_operand.vmem [shape: f32[1,100], index: 2, kind: input, shape index: {}]   ;;  %s745_s3 = inlined_call_operand.vmem [shape: f32[100,100], index: 3, kind: input, shape index: {}]   ;;  %s746_s4 = inlined_call_operand.vmem [shape: f32[1,100], index: 4, kind: input, shape index: {}]   ;;  %s747_s5 = inlined_call_operand.vmem [shape: f32[100,10], index: 5, kind: input, shape index: {}]   ;;  %s748_s6 = inlined_call_operand.vmem [shape: f32[1,10], index: 6, kind: input, shape index: {}]   ;;  %s749_s7 = inlined_call_operand.hbm [shape: f32[2,10], index: 7, kind: output, shape index: {}]  }
   0x1   :  { %v28_v0 = vld [vmem:[%s743_s1] sm:$0xff]  ;;  %v29_v1 = vld [vmem:[%s743_s1 + $0x8] sm:$0xff]  ;;  %v30_v2 = vld [vmem:[%s743_s1 + $0x10] sm:$0xff]  ;;  %463 = vmatprep.subr.bf16.mxu0 %v543_v3  ;;  %402 = vmatprep.mubr.msk.f32.mxu0 %vm544_vm0, %v545_v6 }
   0x2   :  { %v464_v4 = vpack.c.bf16 %v29_v1, %v28_v0  ;;  %v31_v5 = vld [vmem:[%s743_s1 + $0x18] sm:$0xff]  ;;  %475 = vmatprep.subr.bf16.mxu1 %v543_v3  ;;  %431 = vmatprep.mubr.msk.f32.mxu1 %vm544_vm0, %v545_v6  ;;  %v118_v8 = vld [vmem:[%s745_s3] sm:$0xff]  ;;  %v119_v9 = vld [vmem:[%s745_s3 + $0x8] sm:$0xff] }
   0x3   :  { %v467_v7 = vpack.c.bf16 %v31_v5, %v30_v2  ;;  %v120_v10 = vld [vmem:[%s745_s3 + $0x10] sm:$0xff]  ;;  %v32_v11 = vld [vmem:[%s743_s1 + $0x20] sm:$0xff]  ;;  %v33_v12 = vld [vmem:[%s743_s1 + $0x28] sm:$0xff]  ;;  %v476_v13 = vpack.c.bf16 %v119_v9, %v118_v8 }
   0x4   :  { %465 = vmatpush3.bf16.msra.mxu0 %v464_v4  ;;  %v121_v14 = vld [vmem:[%s745_s3 + $0x18] sm:$0xff] }
   0x5   :  { %466 = vmatprep.subr.bf16.mxu0 %v543_v3  ;;  %477 = vmatpush3.bf16.msra.mxu1 %v476_v13  ;;  %v479_v15 = vpack.c.bf16 %v121_v14, %v120_v10 }
   0x6   :  { %12 = vsyncpa [#allocation3], 0  ;;  %v470_v16 = vpack.c.bf16 %v33_v12, %v32_v11  ;;  %478 = vmatprep.subr.bf16.mxu1 %v543_v3  ;;  %v122_v17 = vld [vmem:[%s745_s3 + $0x20] sm:$0xff]  ;;  %v123_v18 = vld [vmem:[%s745_s3 + $0x28] sm:$0xff]  ;;  %vm43_vm1 = vcmask 523264   ;;  %vm142_vm2 = vcmask 1043456  }
   0x7   :  { %v34_v19 = vld [vmem:[%s743_s1 + $0x30] sm:$0xff]  ;;  %v35_v20 = vld [vmem:[%s743_s1 + $0x38] sm:$0xff]  ;;  %v482_v21 = vpack.c.bf16 %v123_v18, %v122_v17  ;;  %v27_v26 = vld [vmem:[%s742_s0] sm:$0x3]  ;;  %vm138_vm3 = vcmask 818176   ;;  %vm313_vm4 = vcmask 74752  }
   0x8   :  { %468 = vmatpush3.bf16.msra.mxu0 %v467_v7  ;;  %v473_v22 = vpack.c.bf16 %v35_v20, %v34_v19  ;;  %v124_v23 = vld [vmem:[%s745_s3 + $0x30] sm:$0xff]  ;;  %v125_v24 = vld [vmem:[%s745_s3 + $0x38] sm:$0xff]  ;;  %v126_v27 = vld [vmem:[%s745_s3 + $0x40] sm:$0xff] }
   0x9   :  { %469 = vmatprep.subr.bf16.mxu0 %v543_v3  ;;  %480 = vmatpush3.bf16.msra.mxu1 %v479_v15  ;;  %v485_v25 = vpack.c.bf16 %v125_v24, %v124_v23  ;;  %v127_v28 = vld [vmem:[%s745_s3 + $0x48] sm:$0xff]  ;;  %v128_v30 = vld [vmem:[%s745_s3 + $0x50] sm:$0xff]  ;;  %v129_v31 = vld [vmem:[%s745_s3 + $0x58] sm:$0xff] }
   0xa   :  { %481 = vmatprep.subr.bf16.mxu1 %v543_v3  ;;  %v488_v29 = vpack.c.bf16 %v127_v28, %v126_v27  ;;  %v491_v32 = vpack.c.bf16 %v129_v31, %v128_v30  ;;  %v130_v33 = vld [vmem:[%s745_s3 + $0x60] sm:$0xf]  ;;  %v218_v35 = vld [vmem:[%s747_s5 + $0x8] sm:$0xff]  ;;  %v219_v36 = vld [vmem:[%s747_s5 + $0x10] sm:$0xff] }
   0xb   :  { %v217_v34 = vld [vmem:[%s747_s5] sm:$0xff]  ;;  %v220_v38 = vld [vmem:[%s747_s5 + $0x18] sm:$0xff]  ;;  %v222_v41 = vld [vmem:[%s747_s5 + $0x28] sm:$0xff] }
   0xc   :  { %471 = vmatpush3.bf16.msra.mxu0 %v470_v16  ;;  %v494_v37 = vpack.c.bf16 %v218_v35, %v217_v34  ;;  %v497_v39 = vpack.c.bf16 %v220_v38, %v219_v36  ;;  %v221_v40 = vld [vmem:[%s747_s5 + $0x20] sm:$0xff]  ;;  %v223_v43 = vld [vmem:[%s747_s5 + $0x30] sm:$0xff]  ;;  %v224_v44 = vld [vmem:[%s747_s5 + $0x38] sm:$0xff] }
   0xd   :  { %472 = vmatprep.subr.bf16.mxu0 %v543_v3  ;;  %483 = vmatpush3.bf16.msra.mxu1 %v482_v21  ;;  %v500_v42 = vpack.c.bf16 %v222_v41, %v221_v40  ;;  %v503_v45 = vpack.c.bf16 %v224_v44, %v223_v43  ;;  %v225_v46 = vld [vmem:[%s747_s5 + $0x40] sm:$0xff]  ;;  %v226_v47 = vld [vmem:[%s747_s5 + $0x48] sm:$0xff]  ;;  %v227_v54 = vld [vmem:[%s747_s5 + $0x50] sm:$0xff] }
   0xe   :  { %484 = vmatprep.subr.bf16.mxu1 %v543_v3  ;;  %v506_v48 = vpack.c.bf16 %v226_v47, %v225_v46  ;;  %v341_v49 = vld [vmem:[%s744_s2] ss:$0 sm:$0xff]  ;;  %v228_v55 = vld [vmem:[%s747_s5 + $0x58] sm:$0xff] }
   0xf   :  { %v509_v56 = vpack.c.bf16 %v228_v55, %v227_v54  ;;  %v229_v57 = vld [vmem:[%s747_s5 + $0x60] sm:$0xf] }
  0x10   :  { %474 = vmatpush3.bf16.msra.mxu0 %v473_v22  ;;  %v343_v58 = vld [vmem:[%s746_s4] ss:$0 sm:$0xff]  ;;  %s546_s4 = smov [#allocation2]  }
  0x11   :  { %493 = vmatprep.subr.bf16.mxu0 %v543_v3  ;;  %486 = vmatpush3.bf16.msra.mxu1 %v485_v25  ;;  %v346_v63 = vld [vmem:[%s748_s6] ss:$0 sm:$0xff]  ;;  %s333_s5 = sshll.u32 %s546_s4, 4  ;;  %s334_s5 = int_to_ptr.vmem [resolvable:$true] %s333_s5 }
  0x12   :  { %487 = vmatprep.subr.bf16.mxu1 %v543_v3  ;;  %s519_s6 = scalar_lea.vmem %s334_s5, 32  ;;  %p524_p1 = scmp.lt.s32.totalorder %s334_s5, %s334_s5 }
  0x13   :  { %403 = vmatmul.mubr.msk.f32.vlgmr.msra.gmra.mrb[0].mxu0 %vm43_vm1, %v27_v26  ;;  %p520_p0 = scmp.ne.s32.totalorder %s334_s5, %s519_s6  ;;  %p525_p2 = scmp.lt.s32.totalorder %s519_s6, %s519_s6 }
  0x14   :  { %460 = vmatprep.mubr.msk.f32.mxu0 %vm544_vm0, %v545_v6  ;;  %495 = vmatpush3.bf16.msra.mxu0 %v494_v37 }
  0x15   :  { %489 = vmatpush3.bf16.msra.mxu1 %v488_v29  ;;  %496 = vmatprep.subr.bf16.mxu0 %v543_v3  ;;  %p526_p3 = por %p525_p2, %p524_p1 }
  0x16   :  { %490 = vmatprep.subr.bf16.mxu1 %v543_v3 }
  0x17   :  { %p527_p4 = pnand %p526_p3, %p520_p0 }
  0x18   :  { %498 = vmatpush3.bf16.msra.mxu0 %v497_v39 }
  0x19   :  { %492 = vmatpush3.bf16.msra.mxu1 %v491_v32  ;;  %499 = vmatprep.subr.bf16.mxu0 %v543_v3 }
  0x1a   :  { %429 = vmatprep.subr.mxu1 %v545_v6 }
  0x1c   :  { %501 = vmatpush3.bf16.msra.mxu0 %v500_v42 }
  0x1d   :  { %430 = vmatpush3.msk.msra.mxu1 %vm142_vm2, %v130_v33  ;;  %502 = vmatprep.subr.bf16.mxu0 %v543_v3 }
  0x20   :  { %504 = vmatpush3.bf16.msra.mxu0 %v503_v45 }
  0x21   :  { %505 = vmatprep.subr.bf16.mxu0 %v543_v3 }
  0x24   :  { %507 = vmatpush3.bf16.msra.mxu0 %v506_v48 }
  0x25   :  { %508 = vmatprep.subr.bf16.mxu0 %v543_v3 }
  0x28   :  { %510 = vmatpush3.bf16.msra.mxu0 %v509_v56 }
  0x29   :  { %458 = vmatprep.subr.mxu0 %v545_v6 }
  0x2c   :  { %459 = vmatpush3.msk.msra.mxu0 %vm142_vm2, %v229_v57 }
  0xe6   :  { %v113_v50 = vpop.f32.mrb[0].mxu0 }
  0xe7   :  { %v114_v51 = vadd.f32 %v341_v49, %v113_v50  ;;  %v404_v52 = vpop.f32.mrb[1].mxu0 }
  0xe9   :  { %v117_v53 = vmax.f32 %v114_v51, 0.0 }
  0xeb   :  { %432 = vmatmul.mubr.msk.f32.vlgmr.msra.gmra.mrb[0].mxu1 %vm138_vm3, %v117_v53 }
 0x1be   :  { %v212_v59 = vpop.f32.mrb[0].mxu1 }
 0x1bf   :  { %v213_v60 = vadd.f32 %v343_v58, %v212_v59  ;;  %v433_v61 = vpop.f32.mrb[1].mxu1 }
 0x1c1   :  { %v216_v62 = vmax.f32 %v213_v60, 0.0 }
 0x1c3   :  { %461 = vmatmul.mubr.msk.f32.vlgmr.msra.gmra.mrb[2].mxu0 %vm138_vm3, %v216_v62 }
 0x296   :  { %v309_v0 = vpop.f32.mrb[2].mxu0 }
 0x297   :  { %v310_v1 = vadd.f32 %v346_v63, %v309_v0  ;;  %v462_v2 = vpop.f32.mrb[3].mxu0 }
 0x299   :  { %v314_v3 = vsel %vm313_vm4, %v310_v1, -inf }
 0x29a   :  { %315 = vmax.xlane.f32.xlu0 %v314_v3 }
 0x327   :  { %v316_v4 = vpop.xlane.xlu0 %315 }
 0x328   :  { %v317_v5 = vsub.f32 %v310_v1, %v316_v4 }
 0x32a   :  { %v318_v6 = vmul.f32 1.442695, %v317_v5 }
 0x32c   :  { %515 = vpow2.f32 %v318_v6 }
 0x336   :  { %v516_v7 = vpop.eup %515 }
 0x337   :  { %v320_v8 = vsel %vm313_vm4, %v516_v7, 0.0 }
 0x338   :  { %321 = vadd.xlane.f32.xlu0 %v320_v8 }
 0x3c5   :  { %v322_v9 = vpop.xlane.xlu0 %321 }
 0x3c6   :  { %517 = vlog2.f32 %v322_v9 }
 0x3d0   :  { %v518_v10 = vpop.eup %517 }
 0x3d1   :  { %v324_v11 = vmul.f32 0.6931472, %v518_v10 }
 0x3d3   :  { %v325_v12 = vsub.f32 %v317_v5, %v324_v11 }
 0x3d5   :  { %326 = vst.msk [vmem:[#allocation2] sm:$0x3] %vm313_vm4, %v325_v12 }
 0x3d6   :  { %530 = shalt.err (!%p527_p4)
}
 0x3d7   :  { %s531_s27 = scalar_lea.hbm %s749_s7, 32 }
 0x3d8   :  { %p532_p5 = scmp.ne.s32.totalorder %s749_s7, %s531_s27  ;;  %p535_p6 = scmp.lt.u32.totalorder %s531_s27, %s749_s7 }
 0x3da   :  { %p537_p7 = pnand %p535_p6, %p532_p5 }
 0x3dc   :  { %540 = shalt.err (!%p537_p7)
}
 0x3dd   :  { %336 = dma.vmem_to_hbm [thread:$0]  %s334_s5, 32, %s749_s7, [#allocation3]  }
 0x3de   :  { %541 = dma.done.wait [#allocation3], 32  }
 0x3df   :  { %542 = vsyncadd [#allocation3], 4294967264 }
 0x3e0   :  { %340 = vsyncpa [#allocation3], 1 }

</bundles_post_ra>
